<compile_context>
chip_gen: v5e
topology: v5e:2x2
jax: 0.10.0
libtpu: 0.0.40
codegen_flags: <defaults>
</compile_context>

<pallas_src>
import jax
import jax.numpy as jnp
from jax.experimental import pallas as pl
from jax.experimental.pallas import tpu as pltpu

LANES = 128  # TPU lane width; hidden / output dims are padded to it.


def _avg_pool_align(ref, pool, tt):
    """AlignSubNet 'avg_pool' grouping as sums of static, tile-aligned
    contiguous sublane slices (VPU adds only), accumulated in f32."""
    if pool == 1:
        return ref[...].astype(jnp.float32)
    acc = ref[:, 0:tt, :].astype(jnp.float32)
    for p in range(1, pool):
        acc = acc + ref[:, p * tt:(p + 1) * tt, :].astype(jnp.float32)
    return acc * (1.0 / pool)


def amio_kernel(text_ref, audio_ref, video_ref,
                wt_ref, wa_ref, wv_ref, b1_ref, w2_ref, b2_ref, out_ref):
    bb, tt, dt = text_ref.shape
    da = audio_ref.shape[2]
    dv = video_ref.shape[2]
    pool_a = audio_ref.shape[1] // tt
    pool_v = video_ref.shape[1] // tt
    hp = wt_ref.shape[1]
    rows = bb * tt
    mxu_dtype = text_ref.dtype

    # --- AlignSubNet('avg_pool'): align audio/video to the text length ------
    a_al = _avg_pool_align(audio_ref, pool_a, tt)            # (BB, Tt, Da) f32
    v_al = _avg_pool_align(video_ref, pool_v, tt)            # (BB, Tt, Dv) f32

    # --- fusion head: three accumulated MXU dots (no concat, no zero-pad) ---
    t2 = text_ref[...].reshape(rows, dt)
    a2 = a_al.astype(mxu_dtype).reshape(rows, da)
    v2 = v_al.astype(mxu_dtype).reshape(rows, dv)
    h = jnp.dot(t2, wt_ref[...], preferred_element_type=jnp.float32)
    h = h + jnp.dot(a2, wa_ref[...], preferred_element_type=jnp.float32)
    h = h + jnp.dot(v2, wv_ref[...], preferred_element_type=jnp.float32)
    h = jnp.maximum(h + b1_ref[...], 0.0)                    # (rows, Hp) f32

    # --- time-mean + output projection ---------------------------------------
    # Sum over time first (smaller MXU M); 1/Tt is folded into w2 in the
    # wrapper.  The second matmul replaces the previous VPU multiply +
    # cross-lane reduce + broadcast; output block is lane-dense (BB, 128).
    hs = jnp.sum(h.reshape(bb, tt, hp), axis=1)               # (BB, Hp) f32
    out = jnp.dot(hs, w2_ref[...], preferred_element_type=jnp.float32)
    out_ref[...] = (out + b2_ref[...]).astype(out_ref.dtype)


def _pick_batch_block(B, Tt, target_rows=256):
    """BB: multiple of 8 dividing B, rows = BB*Tt near `target_rows`, keeping
    at least 2 grid steps (megacore).  v5e: use target_rows=128.  v7x with
    large B: prefer BB giving >= 8 grid steps for pipeline steady state."""
    best = None
    for d in range(8, B, 8):
        if B % d or B // d < 2:
            continue
        if best is None or abs(d * Tt - target_rows) < abs(best * Tt - target_rows):
            best = d
    return best if best is not None else B


def amio_forward(text_x, audio_x, video_x, params, *,
                 batch_block=None, pool_mode="grouped", compute_dtype=None):
    B, Tt, Dt = text_x.shape
    _, Ta, Da = audio_x.shape
    _, Tv, Dv = video_x.shape
    # TODO(synk): AlignSubNet pads ragged sequences with the last frame; here
    # exact multiples are required (pad + mask in the wrapper otherwise).
    assert Ta % Tt == 0 and Tv % Tt == 0, "seq lens must be multiples of text len"
    assert Tt % 8 == 0, "text length must be sublane-aligned for flattened matmul"
    Wt, Wa, Wv, b1, W2, b2 = params
    H = Wt.shape[1]
    Ho = W2.shape[1]

    f32 = jnp.float32
    cd = text_x.dtype if compute_dtype is None else compute_dtype

    if batch_block is None:
        batch_block = _pick_batch_block(B, Tt)
    BB = batch_block
    assert B % BB == 0 and (BB % 8 == 0 or BB == B)

    if pool_mode == "window":
        # Contiguous-window pooling == grouped pooling on a time-permuted
        # sequence; do the permutation wrapper-side (layout plumbing only).
        def to_grouped(x):
            Bx, T, D = x.shape
            pool = T // Tt
            if pool == 1:
                return x
            return x.reshape(Bx, Tt, pool, D).transpose(0, 2, 1, 3).reshape(Bx, T, D)
        audio_x = to_grouped(audio_x)
        video_x = to_grouped(video_x)
    else:
        assert pool_mode == "grouped"

    Hp = pl.cdiv(H, LANES) * LANES
    OP = pl.cdiv(Ho, LANES) * LANES

    # Lane-pad parameters wrapper-side (no in-kernel padding work).
    def pad2(w, nrows, ncols, dtype):
        out = jnp.zeros((nrows, ncols), dtype)
        return out.at[:w.shape[0], :w.shape[1]].set(w.astype(dtype))

    Wt_p = pad2(Wt, Dt, Hp, cd)
    Wa_p = pad2(Wa, Da, Hp, cd)
    Wv_p = pad2(Wv, Dv, Hp, cd)
    b1_p = pad2(b1.reshape(1, H), 1, Hp, f32)
    W2_p = pad2(W2.astype(f32) / Tt, Hp, OP, f32)    # fold 1/Tt time-mean into W2
    b2_p = pad2(b2.reshape(1, Ho), 1, OP, f32)

    text_c = text_x.astype(cd)
    audio_c = audio_x.astype(cd)
    video_c = video_x.astype(cd)

    def run(param_pipeline_mode):
        def const_spec(shape):
            idx = lambda b: (0, 0)
            if param_pipeline_mode is None:
                return pl.BlockSpec(shape, idx)
            return pl.BlockSpec(shape, idx, pipeline_mode=param_pipeline_mode)

        grid_spec = pltpu.PrefetchScalarGridSpec(
            num_scalar_prefetch=0,
            grid=(B // BB,),
            in_specs=[
                pl.BlockSpec((BB, Tt, Dt), lambda b: (b, 0, 0)),
                pl.BlockSpec((BB, Ta, Da), lambda b: (b, 0, 0)),
                pl.BlockSpec((BB, Tv, Dv), lambda b: (b, 0, 0)),
                const_spec((Dt, Hp)),
                const_spec((Da, Hp)),
                const_spec((Dv, Hp)),
                const_spec((1, Hp)),
                const_spec((Hp, OP)),
                const_spec((1, OP)),
            ],
            out_specs=pl.BlockSpec((BB, OP), lambda b: (b, 0)),
        )
        out = pl.pallas_call(
            amio_kernel,
            out_shape=jax.ShapeDtypeStruct((B, OP), jnp.float32),
            grid_spec=grid_spec,
            compiler_params=pltpu.CompilerParams(
                dimension_semantics=("parallel",),
                vmem_limit_bytes=40 * 1024 * 1024),  # headroom under v7x 64 MiB
        )(text_c, audio_c, video_c, Wt_p, Wa_p, Wv_p, b1_p, W2_p, b2_p)
        return jax.block_until_ready(out)

    try:
        # Constant parameter blocks never revisit -> request single-buffering.
        out_padded = run(pl.Buffered(1))
    except Exception:
        # Fallback for JAX versions without BlockSpec pipeline_mode support.
        out_padded = run(None)

    return out_padded[:, :Ho]


def amio_reference(text_x, audio_x, video_x, params, pool_mode="grouped"):
    """Pure-JAX reference for the same forward."""
    Wt, Wa, Wv, b1, W2, b2 = params
    B, Tt, _ = text_x.shape

    def align(x):
        pool = x.shape[1] // Tt
        if pool == 1:
            return x
        if pool_mode == "grouped":
            return x.reshape(B, pool, Tt, -1).mean(axis=1)
        return x.reshape(B, Tt, pool, -1).mean(axis=2)

    a_al = align(audio_x)
    v_al = align(video_x)
    h = jax.nn.relu(text_x @ Wt + a_al @ Wa + v_al @ Wv + b1)
    pooled = h.mean(axis=1)
    return pooled @ W2 + b2


if __name__ == "__main__":
    key = jax.random.PRNGKey(0)
    kt, ka, kv, k1, k2, k3, k4, k5, k6 = jax.random.split(key, 9)

    # Small shapes consistent with the multimodal forward.
    B, Tt, Dt = 16, 8, 32        # text
    Ta, Da = 16, 16              # audio (pool = 2)
    Tv, Dv = 32, 24              # video (pool = 4)
    H, Ho = 32, 1                # fusion hidden, regression output

    text_x = jax.random.normal(kt, (B, Tt, Dt), dtype=jnp.float32)
    audio_x = jax.random.normal(ka, (B, Ta, Da), dtype=jnp.float32)
    video_x = jax.random.normal(kv, (B, Tv, Dv), dtype=jnp.float32)

    Wt = jax.random.normal(k1, (Dt, H), jnp.float32) * (2.0 / (Dt + H)) ** 0.5
    Wa = jax.random.normal(k2, (Da, H), jnp.float32) * (2.0 / (Da + H)) ** 0.5
    Wv = jax.random.normal(k3, (Dv, H), jnp.float32) * (2.0 / (Dv + H)) ** 0.5
    b1 = jax.random.normal(k5, (1, H), jnp.float32) * 0.1
    W2 = jax.random.normal(k4, (H, Ho), jnp.float32) * (2.0 / (H + Ho)) ** 0.5
    b2 = jax.random.normal(k6, (1, Ho), jnp.float32) * 0.1
    params = (Wt, Wa, Wv, b1, W2, b2)

    # 1) f32, MMSA-source ('grouped') pooling — exact check.
    out = jax.block_until_ready(amio_forward(text_x, audio_x, video_x, params))
    ref = amio_reference(text_x, audio_x, video_x, params, pool_mode="grouped")
    assert out.shape == (B, Ho)
    assert jnp.allclose(out, ref, atol=1e-4, rtol=1e-4)

    # 2) f32, contiguous-window ('window') pooling variant.
    out_w = jax.block_until_ready(
        amio_forward(text_x, audio_x, video_x, params, pool_mode="window"))
    ref_w = amio_reference(text_x, audio_x, video_x, params, pool_mode="window")
    assert jnp.allclose(out_w, ref_w, atol=1e-4, rtol=1e-4)

    # 3) bf16 MXU operands (v6e/v7x path), f32 accumulation — loose check.
    out_bf = jax.block_until_ready(
        amio_forward(text_x, audio_x, video_x, params,
                     compute_dtype=jnp.bfloat16))
    assert jnp.allclose(out_bf, ref, atol=2e-1, rtol=2e-1)

    print("KERNEL_OK")
</pallas_src>

<mosaic_0001>
module attributes {stable_mosaic.version = 11 : i64} {
  func.func @amio_kernel(%arg0: i32, %arg1: memref<8x8x32xf32, #tpu.memory_space<vmem>>, %arg2: memref<8x16x16xf32, #tpu.memory_space<vmem>>, %arg3: memref<8x32x24xf32, #tpu.memory_space<vmem>>, %arg4: memref<32x128xf32, #tpu.memory_space<vmem>>, %arg5: memref<16x128xf32, #tpu.memory_space<vmem>>, %arg6: memref<24x128xf32, #tpu.memory_space<vmem>>, %arg7: memref<1x128xf32, #tpu.memory_space<vmem>>, %arg8: memref<128x128xf32, #tpu.memory_space<vmem>>, %arg9: memref<1x128xf32, #tpu.memory_space<vmem>>, %arg10: memref<8x128xf32, #tpu.memory_space<vmem>>) attributes {dimension_semantics = [#tpu.dimension_semantics<parallel>], iteration_bounds = array<i64: 2>, scalar_prefetch = 0 : i64, scratch_operands = 0 : i64, tpu.core_type = #tpu.core_type<tc>, window_params = [{transform_indices = @transform_0, window_bounds = array<i64: 8, 8, 32>}, {transform_indices = @transform_1, window_bounds = array<i64: 8, 16, 16>}, {transform_indices = @transform_2, window_bounds = array<i64: 8, 32, 24>}, {pipeline_mode = #tpu.pipeline_mode<synchronous>, transform_indices = @transform_3, window_bounds = array<i64: 32, 128>}, {pipeline_mode = #tpu.pipeline_mode<synchronous>, transform_indices = @transform_4, window_bounds = array<i64: 16, 128>}, {pipeline_mode = #tpu.pipeline_mode<synchronous>, transform_indices = @transform_5, window_bounds = array<i64: 24, 128>}, {pipeline_mode = #tpu.pipeline_mode<synchronous>, transform_indices = @transform_6, window_bounds = array<i64: 1, 128>}, {pipeline_mode = #tpu.pipeline_mode<synchronous>, transform_indices = @transform_7, window_bounds = array<i64: 128, 128>}, {pipeline_mode = #tpu.pipeline_mode<synchronous>, transform_indices = @transform_8, window_bounds = array<i64: 1, 128>}, {transform_indices = @transform_9, window_bounds = array<i64: 8, 128>}]} {
    %c0 = arith.constant 0 : index
    %c0_0 = arith.constant 0 : index
    %c0_1 = arith.constant 0 : index
    %0 = vector.load %arg2[%c0, %c0_0, %c0_1] : memref<8x16x16xf32, #tpu.memory_space<vmem>>, vector<8x8x16xf32>
    %c0_2 = arith.constant 0 : index
    %c8 = arith.constant 8 : index
    %c0_3 = arith.constant 0 : index
    %1 = vector.load %arg2[%c0_2, %c8, %c0_3] : memref<8x16x16xf32, #tpu.memory_space<vmem>>, vector<8x8x16xf32>
    %2 = arith.addf %0, %1 : vector<8x8x16xf32>
    %cst = arith.constant 5.000000e-01 : f32
    %3 = vector.broadcast %cst : f32 to vector<8x8x16xf32>
    %4 = arith.mulf %2, %3 : vector<8x8x16xf32>
    %c0_4 = arith.constant 0 : index
    %c0_5 = arith.constant 0 : index
    %c0_6 = arith.constant 0 : index
    %5 = vector.load %arg3[%c0_4, %c0_5, %c0_6] : memref<8x32x24xf32, #tpu.memory_space<vmem>>, vector<8x8x24xf32>
    %c0_7 = arith.constant 0 : index
    %c8_8 = arith.constant 8 : index
    %c0_9 = arith.constant 0 : index
    %6 = vector.load %arg3[%c0_7, %c8_8, %c0_9] : memref<8x32x24xf32, #tpu.memory_space<vmem>>, vector<8x8x24xf32>
    %7 = arith.addf %5, %6 : vector<8x8x24xf32>
    %c0_10 = arith.constant 0 : index
    %c16 = arith.constant 16 : index
    %c0_11 = arith.constant 0 : index
    %8 = vector.load %arg3[%c0_10, %c16, %c0_11] : memref<8x32x24xf32, #tpu.memory_space<vmem>>, vector<8x8x24xf32>
    %9 = arith.addf %7, %8 : vector<8x8x24xf32>
    %c0_12 = arith.constant 0 : index
    %c24 = arith.constant 24 : index
    %c0_13 = arith.constant 0 : index
    %10 = vector.load %arg3[%c0_12, %c24, %c0_13] : memref<8x32x24xf32, #tpu.memory_space<vmem>>, vector<8x8x24xf32>
    %11 = arith.addf %9, %10 : vector<8x8x24xf32>
    %cst_14 = arith.constant 2.500000e-01 : f32
    %12 = vector.broadcast %cst_14 : f32 to vector<8x8x24xf32>
    %13 = arith.mulf %11, %12 : vector<8x8x24xf32>
    %c0_15 = arith.constant 0 : index
    %c0_16 = arith.constant 0 : index
    %c0_17 = arith.constant 0 : index
    %14 = vector.load %arg1[%c0_15, %c0_16, %c0_17] : memref<8x8x32xf32, #tpu.memory_space<vmem>>, vector<8x8x32xf32>
    %15 = vector.shape_cast %14 : vector<8x8x32xf32> to vector<64x32xf32>
    %16 = vector.shape_cast %4 : vector<8x8x16xf32> to vector<64x16xf32>
    %17 = vector.shape_cast %13 : vector<8x8x24xf32> to vector<64x24xf32>
    %c0_18 = arith.constant 0 : index
    %c0_19 = arith.constant 0 : index
    %18 = vector.load %arg4[%c0_18, %c0_19] : memref<32x128xf32, #tpu.memory_space<vmem>>, vector<32x128xf32>
    %cst_20 = arith.constant dense<0.000000e+00> : vector<64x128xf32>
    %19 = tpu.matmul %15, %18, %cst_20 {dimension_numbers = #tpu.dot_dimension_numbers<[1], [0], [0], [1], [0, 0, 1, 1], [], []>} : vector<64x32xf32>, vector<32x128xf32>, vector<64x128xf32> -> vector<64x128xf32>
    %c0_21 = arith.constant 0 : index
    %c0_22 = arith.constant 0 : index
    %20 = vector.load %arg5[%c0_21, %c0_22] : memref<16x128xf32, #tpu.memory_space<vmem>>, vector<16x128xf32>
    %cst_23 = arith.constant dense<0.000000e+00> : vector<64x128xf32>
    %21 = tpu.matmul %16, %20, %cst_23 {dimension_numbers = #tpu.dot_dimension_numbers<[1], [0], [0], [1], [0, 0, 1, 1], [], []>} : vector<64x16xf32>, vector<16x128xf32>, vector<64x128xf32> -> vector<64x128xf32>
    %22 = arith.addf %19, %21 : vector<64x128xf32>
    %c0_24 = arith.constant 0 : index
    %c0_25 = arith.constant 0 : index
    %23 = vector.load %arg6[%c0_24, %c0_25] : memref<24x128xf32, #tpu.memory_space<vmem>>, vector<24x128xf32>
    %cst_26 = arith.constant dense<0.000000e+00> : vector<64x128xf32>
    %24 = tpu.matmul %17, %23, %cst_26 {dimension_numbers = #tpu.dot_dimension_numbers<[1], [0], [0], [1], [0, 0, 1, 1], [], []>} : vector<64x24xf32>, vector<24x128xf32>, vector<64x128xf32> -> vector<64x128xf32>
    %25 = arith.addf %22, %24 : vector<64x128xf32>
    %c0_27 = arith.constant 0 : index
    %c0_28 = arith.constant 0 : index
    %26 = vector.load %arg7[%c0_27, %c0_28] : memref<1x128xf32, #tpu.memory_space<vmem>>, vector<1x128xf32>
    %27 = vector.broadcast %26 : vector<1x128xf32> to vector<64x128xf32>
    %28 = arith.addf %25, %27 : vector<64x128xf32>
    %cst_29 = arith.constant 0.000000e+00 : f32
    %29 = vector.broadcast %cst_29 : f32 to vector<64x128xf32>
    %30 = arith.maximumf %28, %29 : vector<64x128xf32>
    %31 = vector.shape_cast %30 : vector<64x128xf32> to vector<8x8x128xf32>
    %cst_30 = arith.constant dense<0.000000e+00> : vector<8x128xf32>
    %32 = vector.multi_reduction <add>, %31, %cst_30 [1] : vector<8x8x128xf32> to vector<8x128xf32>
    %c0_31 = arith.constant 0 : index
    %c0_32 = arith.constant 0 : index
    %33 = vector.load %arg8[%c0_31, %c0_32] : memref<128x128xf32, #tpu.memory_space<vmem>>, vector<128x128xf32>
    %cst_33 = arith.constant dense<0.000000e+00> : vector<8x128xf32>
    %34 = tpu.matmul %32, %33, %cst_33 {dimension_numbers = #tpu.dot_dimension_numbers<[1], [0], [0], [1], [0, 0, 1, 1], [], []>} : vector<8x128xf32>, vector<128x128xf32>, vector<8x128xf32> -> vector<8x128xf32>
    %c0_34 = arith.constant 0 : index
    %c0_35 = arith.constant 0 : index
    %35 = vector.load %arg9[%c0_34, %c0_35] : memref<1x128xf32, #tpu.memory_space<vmem>>, vector<1x128xf32>
    %36 = vector.broadcast %35 : vector<1x128xf32> to vector<8x128xf32>
    %37 = arith.addf %34, %36 : vector<8x128xf32>
    %c0_36 = arith.constant 0 : index
    %c0_37 = arith.constant 0 : index
    %38 = vector.load %arg10[%c0_36, %c0_37] : memref<8x128xf32, #tpu.memory_space<vmem>>, vector<8x128xf32>
    tpu.vector_store %arg10[%c0_36, %c0_37], %37 {strides = array<i32>} : memref<8x128xf32, #tpu.memory_space<vmem>>, vector<8x128xf32>,
    return
  }
  func.func @transform_0(%arg0: i32) -> (i32, i32, i32) {
    %c0_i32 = arith.constant 0 : i32
    %c0_i32_0 = arith.constant 0 : i32
    %c0_i32_1 = arith.constant 0 : i32
    return %arg0, %c0_i32, %c0_i32_0 : i32, i32, i32
  }
  func.func @transform_1(%arg0: i32) -> (i32, i32, i32) {
    %c0_i32 = arith.constant 0 : i32
    %c0_i32_0 = arith.constant 0 : i32
    %c0_i32_1 = arith.constant 0 : i32
    return %arg0, %c0_i32, %c0_i32_0 : i32, i32, i32
  }
  func.func @transform_2(%arg0: i32) -> (i32, i32, i32) {
    %c0_i32 = arith.constant 0 : i32
    %c0_i32_0 = arith.constant 0 : i32
    %c0_i32_1 = arith.constant 0 : i32
    return %arg0, %c0_i32, %c0_i32_0 : i32, i32, i32
  }
  func.func @transform_3(%arg0: i32) -> (i32, i32) {
    %c0_i32 = arith.constant 0 : i32
    %c0_i32_0 = arith.constant 0 : i32
    %c0_i32_1 = arith.constant 0 : i32
    return %c0_i32, %c0_i32_0 : i32, i32
  }
  func.func @transform_4(%arg0: i32) -> (i32, i32) {
    %c0_i32 = arith.constant 0 : i32
    %c0_i32_0 = arith.constant 0 : i32
    %c0_i32_1 = arith.constant 0 : i32
    return %c0_i32, %c0_i32_0 : i32, i32
  }
  func.func @transform_5(%arg0: i32) -> (i32, i32) {
    %c0_i32 = arith.constant 0 : i32
    %c0_i32_0 = arith.constant 0 : i32
    %c0_i32_1 = arith.constant 0 : i32
    return %c0_i32, %c0_i32_0 : i32, i32
  }
  func.func @transform_6(%arg0: i32) -> (i32, i32) {
    %c0_i32 = arith.constant 0 : i32
    %c0_i32_0 = arith.constant 0 : i32
    %c0_i32_1 = arith.constant 0 : i32
    return %c0_i32, %c0_i32_0 : i32, i32
  }
  func.func @transform_7(%arg0: i32) -> (i32, i32) {
    %c0_i32 = arith.constant 0 : i32
    %c0_i32_0 = arith.constant 0 : i32
    %c0_i32_1 = arith.constant 0 : i32
    return %c0_i32, %c0_i32_0 : i32, i32
  }
  func.func @transform_8(%arg0: i32) -> (i32, i32) {
    %c0_i32 = arith.constant 0 : i32
    %c0_i32_0 = arith.constant 0 : i32
    %c0_i32_1 = arith.constant 0 : i32
    return %c0_i32, %c0_i32_0 : i32, i32
  }
  func.func @transform_9(%arg0: i32) -> (i32, i32) {
    %c0_i32 = arith.constant 0 : i32
    %c0_i32_0 = arith.constant 0 : i32
    return %arg0, %c0_i32 : i32, i32
  }
}

module attributes {stable_mosaic.version = 11 : i64} {
  func.func @amio_kernel(%arg0: i32, %arg1: memref<8x8x32xf32, #tpu.memory_space<vmem>>, %arg2: memref<8x16x16xf32, #tpu.memory_space<vmem>>, %arg3: memref<8x32x24xf32, #tpu.memory_space<vmem>>, %arg4: memref<32x128xf32, #tpu.memory_space<vmem>>, %arg5: memref<16x128xf32, #tpu.memory_space<vmem>>, %arg6: memref<24x128xf32, #tpu.memory_space<vmem>>, %arg7: memref<1x128xf32, #tpu.memory_space<vmem>>, %arg8: memref<128x128xf32, #tpu.memory_space<vmem>>, %arg9: memref<1x128xf32, #tpu.memory_space<vmem>>, %arg10: memref<8x128xf32, #tpu.memory_space<vmem>>) attributes {dimension_semantics = [#tpu.dimension_semantics<parallel>], iteration_bounds = array<i64: 2>, scalar_prefetch = 0 : i64, scratch_operands = 0 : i64, tpu.core_type = #tpu.core_type<tc>, window_params = [{transform_indices = @transform_0, window_bounds = array<i64: 8, 8, 32>}, {transform_indices = @transform_1, window_bounds = array<i64: 8, 16, 16>}, {transform_indices = @transform_2, window_bounds = array<i64: 8, 32, 24>}, {pipeline_mode = #tpu.pipeline_mode<synchronous>, transform_indices = @transform_3, window_bounds = array<i64: 32, 128>}, {pipeline_mode = #tpu.pipeline_mode<synchronous>, transform_indices = @transform_4, window_bounds = array<i64: 16, 128>}, {pipeline_mode = #tpu.pipeline_mode<synchronous>, transform_indices = @transform_5, window_bounds = array<i64: 24, 128>}, {pipeline_mode = #tpu.pipeline_mode<synchronous>, transform_indices = @transform_6, window_bounds = array<i64: 1, 128>}, {pipeline_mode = #tpu.pipeline_mode<synchronous>, transform_indices = @transform_7, window_bounds = array<i64: 128, 128>}, {pipeline_mode = #tpu.pipeline_mode<synchronous>, transform_indices = @transform_8, window_bounds = array<i64: 1, 128>}, {transform_indices = @transform_9, window_bounds = array<i64: 8, 128>}]} {
    %c0 = arith.constant 0 : index
    %c0_0 = arith.constant 0 : index
    %c0_1 = arith.constant 0 : index
    %0 = vector.load %arg2[%c0, %c0_0, %c0_1] : memref<8x16x16xf32, #tpu.memory_space<vmem>>, vector<8x8x16xf32>
    %c0_2 = arith.constant 0 : index
    %c8 = arith.constant 8 : index
    %c0_3 = arith.constant 0 : index
    %1 = vector.load %arg2[%c0_2, %c8, %c0_3] : memref<8x16x16xf32, #tpu.memory_space<vmem>>, vector<8x8x16xf32>
    %2 = arith.addf %0, %1 : vector<8x8x16xf32>
    %cst = arith.constant 5.000000e-01 : f32
    %3 = vector.broadcast %cst : f32 to vector<8x8x16xf32>
    %4 = arith.mulf %2, %3 : vector<8x8x16xf32>
    %c0_4 = arith.constant 0 : index
    %c0_5 = arith.constant 0 : index
    %c0_6 = arith.constant 0 : index
    %5 = vector.load %arg3[%c0_4, %c0_5, %c0_6] : memref<8x32x24xf32, #tpu.memory_space<vmem>>, vector<8x8x24xf32>
    %c0_7 = arith.constant 0 : index
    %c8_8 = arith.constant 8 : index
    %c0_9 = arith.constant 0 : index
    %6 = vector.load %arg3[%c0_7, %c8_8, %c0_9] : memref<8x32x24xf32, #tpu.memory_space<vmem>>, vector<8x8x24xf32>
    %7 = arith.addf %5, %6 : vector<8x8x24xf32>
    %c0_10 = arith.constant 0 : index
    %c16 = arith.constant 16 : index
    %c0_11 = arith.constant 0 : index
    %8 = vector.load %arg3[%c0_10, %c16, %c0_11] : memref<8x32x24xf32, #tpu.memory_space<vmem>>, vector<8x8x24xf32>
    %9 = arith.addf %7, %8 : vector<8x8x24xf32>
    %c0_12 = arith.constant 0 : index
    %c24 = arith.constant 24 : index
    %c0_13 = arith.constant 0 : index
    %10 = vector.load %arg3[%c0_12, %c24, %c0_13] : memref<8x32x24xf32, #tpu.memory_space<vmem>>, vector<8x8x24xf32>
    %11 = arith.addf %9, %10 : vector<8x8x24xf32>
    %cst_14 = arith.constant 2.500000e-01 : f32
    %12 = vector.broadcast %cst_14 : f32 to vector<8x8x24xf32>
    %13 = arith.mulf %11, %12 : vector<8x8x24xf32>
    %c0_15 = arith.constant 0 : index
    %c0_16 = arith.constant 0 : index
    %c0_17 = arith.constant 0 : index
    %14 = vector.load %arg1[%c0_15, %c0_16, %c0_17] : memref<8x8x32xf32, #tpu.memory_space<vmem>>, vector<8x8x32xf32>
    %15 = vector.shape_cast %14 : vector<8x8x32xf32> to vector<64x32xf32>
    %16 = vector.shape_cast %4 : vector<8x8x16xf32> to vector<64x16xf32>
    %17 = vector.shape_cast %13 : vector<8x8x24xf32> to vector<64x24xf32>
    %c0_18 = arith.constant 0 : index
    %c0_19 = arith.constant 0 : index
    %18 = vector.load %arg4[%c0_18, %c0_19] : memref<32x128xf32, #tpu.memory_space<vmem>>, vector<32x128xf32>
    %cst_20 = arith.constant dense<0.000000e+00> : vector<64x128xf32>
    %19 = tpu.matmul %15, %18, %cst_20 {dimension_numbers = #tpu.dot_dimension_numbers<[1], [0], [0], [1], [0, 0, 1, 1], [], []>} : vector<64x32xf32>, vector<32x128xf32>, vector<64x128xf32> -> vector<64x128xf32>
    %c0_21 = arith.constant 0 : index
    %c0_22 = arith.constant 0 : index
    %20 = vector.load %arg5[%c0_21, %c0_22] : memref<16x128xf32, #tpu.memory_space<vmem>>, vector<16x128xf32>
    %cst_23 = arith.constant dense<0.000000e+00> : vector<64x128xf32>
    %21 = tpu.matmul %16, %20, %cst_23 {dimension_numbers = #tpu.dot_dimension_numbers<[1], [0], [0], [1], [0, 0, 1, 1], [], []>} : vector<64x16xf32>, vector<16x128xf32>, vector<64x128xf32> -> vector<64x128xf32>
    %22 = arith.addf %19, %21 : vector<64x128xf32>
    %c0_24 = arith.constant 0 : index
    %c0_25 = arith.constant 0 : index
    %23 = vector.load %arg6[%c0_24, %c0_25] : memref<24x128xf32, #tpu.memory_space<vmem>>, vector<24x128xf32>
    %cst_26 = arith.constant dense<0.000000e+00> : vector<64x128xf32>
    %24 = tpu.matmul %17, %23, %cst_26 {dimension_numbers = #tpu.dot_dimension_numbers<[1], [0], [0], [1], [0, 0, 1, 1], [], []>} : vector<64x24xf32>, vector<24x128xf32>, vector<64x128xf32> -> vector<64x128xf32>
    %25 = arith.addf %22, %24 : vector<64x128xf32>
    %c0_27 = arith.constant 0 : index
    %c0_28 = arith.constant 0 : index
    %26 = vector.load %arg7[%c0_27, %c0_28] : memref<1x128xf32, #tpu.memory_space<vmem>>, vector<1x128xf32>
    %27 = vector.broadcast %26 : vector<1x128xf32> to vector<64x128xf32>
    %28 = arith.addf %25, %27 : vector<64x128xf32>
    %cst_29 = arith.constant 0.000000e+00 : f32
    %29 = vector.broadcast %cst_29 : f32 to vector<64x128xf32>
    %30 = arith.maximumf %28, %29 : vector<64x128xf32>
    %31 = vector.shape_cast %30 : vector<64x128xf32> to vector<8x8x128xf32>
    %cst_30 = arith.constant dense<0.000000e+00> : vector<8x128xf32>
    %32 = vector.multi_reduction <add>, %31, %cst_30 [1] : vector<8x8x128xf32> to vector<8x128xf32>
    %c0_31 = arith.constant 0 : index
    %c0_32 = arith.constant 0 : index
    %33 = vector.load %arg8[%c0_31, %c0_32] : memref<128x128xf32, #tpu.memory_space<vmem>>, vector<128x128xf32>
    %cst_33 = arith.constant dense<0.000000e+00> : vector<8x128xf32>
    %34 = tpu.matmul %32, %33, %cst_33 {dimension_numbers = #tpu.dot_dimension_numbers<[1], [0], [0], [1], [0, 0, 1, 1], [], []>} : vector<8x128xf32>, vector<128x128xf32>, vector<8x128xf32> -> vector<8x128xf32>
    %c0_34 = arith.constant 0 : index
    %c0_35 = arith.constant 0 : index
    %35 = vector.load %arg9[%c0_34, %c0_35] : memref<1x128xf32, #tpu.memory_space<vmem>>, vector<1x128xf32>
    %36 = vector.broadcast %35 : vector<1x128xf32> to vector<8x128xf32>
    %37 = arith.addf %34, %36 : vector<8x128xf32>
    %c0_36 = arith.constant 0 : index
    %c0_37 = arith.constant 0 : index
    %38 = vector.load %arg10[%c0_36, %c0_37] : memref<8x128xf32, #tpu.memory_space<vmem>>, vector<8x128xf32>
    tpu.vector_store %arg10[%c0_36, %c0_37], %37 {strides = array<i32>} : memref<8x128xf32, #tpu.memory_space<vmem>>, vector<8x128xf32>,
    return
  }
  func.func @transform_0(%arg0: i32) -> (i32, i32, i32) {
    %c0_i32 = arith.constant 0 : i32
    %c0_i32_0 = arith.constant 0 : i32
    %c0_i32_1 = arith.constant 0 : i32
    return %arg0, %c0_i32, %c0_i32_0 : i32, i32, i32
  }
  func.func @transform_1(%arg0: i32) -> (i32, i32, i32) {
    %c0_i32 = arith.constant 0 : i32
    %c0_i32_0 = arith.constant 0 : i32
    %c0_i32_1 = arith.constant 0 : i32
    return %arg0, %c0_i32, %c0_i32_0 : i32, i32, i32
  }
  func.func @transform_2(%arg0: i32) -> (i32, i32, i32) {
    %c0_i32 = arith.constant 0 : i32
    %c0_i32_0 = arith.constant 0 : i32
    %c0_i32_1 = arith.constant 0 : i32
    return %arg0, %c0_i32, %c0_i32_0 : i32, i32, i32
  }
  func.func @transform_3(%arg0: i32) -> (i32, i32) {
    %c0_i32 = arith.constant 0 : i32
    %c0_i32_0 = arith.constant 0 : i32
    %c0_i32_1 = arith.constant 0 : i32
    return %c0_i32, %c0_i32_0 : i32, i32
  }
  func.func @transform_4(%arg0: i32) -> (i32, i32) {
    %c0_i32 = arith.constant 0 : i32
    %c0_i32_0 = arith.constant 0 : i32
    %c0_i32_1 = arith.constant 0 : i32
    return %c0_i32, %c0_i32_0 : i32, i32
  }
  func.func @transform_5(%arg0: i32) -> (i32, i32) {
    %c0_i32 = arith.constant 0 : i32
    %c0_i32_0 = arith.constant 0 : i32
    %c0_i32_1 = arith.constant 0 : i32
    return %c0_i32, %c0_i32_0 : i32, i32
  }
  func.func @transform_6(%arg0: i32) -> (i32, i32) {
    %c0_i32 = arith.constant 0 : i32
    %c0_i32_0 = arith.constant 0 : i32
    %c0_i32_1 = arith.constant 0 : i32
    return %c0_i32, %c0_i32_0 : i32, i32
  }
  func.func @transform_7(%arg0: i32) -> (i32, i32) {
    %c0_i32 = arith.constant 0 : i32
    %c0_i32_0 = arith.constant 0 : i32
    %c0_i32_1 = arith.constant 0 : i32
    return %c0_i32, %c0_i32_0 : i32, i32
  }
  func.func @transform_8(%arg0: i32) -> (i32, i32) {
    %c0_i32 = arith.constant 0 : i32
    %c0_i32_0 = arith.constant 0 : i32
    %c0_i32_1 = arith.constant 0 : i32
    return %c0_i32, %c0_i32_0 : i32, i32
  }
  func.func @transform_9(%arg0: i32) -> (i32, i32) {
    %c0_i32 = arith.constant 0 : i32
    %c0_i32_0 = arith.constant 0 : i32
    return %arg0, %c0_i32 : i32, i32
  }
}

</mosaic_0001>

<bundles_post_ra>
// kernel: tpu_custom_call.1
= control target key start
LH: loop header
LB: loop body
LE: loop exit
PB: predicated region body
PF: predicated region fallthrough
CT: control target
= control target key end

     0   :  { %s1398_s0 = inlined_call_operand.vmem [shape: f32[16,8,32], index: 0, kind: input, shape index: {}]   ;;  %s1399_s1 = inlined_call_operand.vmem [shape: f32[16,16,16], index: 1, kind: input, shape index: {}]   ;;  %s1400_s2 = inlined_call_operand.vmem [shape: f32[16,32,24], index: 2, kind: input, shape index: {}]   ;;  %s1401_s3 = inlined_call_operand.vmem [shape: f32[32,128], index: 3, kind: input, shape index: {}]   ;;  %s1402_s4 = inlined_call_operand.vmem [shape: f32[16,128], index: 4, kind: input, shape index: {}]   ;;  %s1403_s5 = inlined_call_operand.vmem [shape: f32[24,128], index: 5, kind: input, shape index: {}]   ;;  %s1404_s6 = inlined_call_operand.vmem [shape: f32[1,128], index: 6, kind: input, shape index: {}]   ;;  %s1405_s7 = inlined_call_operand.vmem [shape: f32[128,128], index: 7, kind: input, shape index: {}]   ;;  %s1406_s8 = inlined_call_operand.vmem [shape: f32[1,128], index: 8, kind: input, shape index: {}]   ;;  %s1407_s9 = inlined_call_operand.hbm [shape: f32[16,128], index: 9, kind: output, shape index: {}]  }
   0x1   :  { %1408 = sst [smem:[#allocation5_spill]] %s1398_s0 }
   0x2   :  { %14 = vsyncpa [#allocation3], 0 }
   0x3   :  { %16 = vsyncpa [#allocation3 + $0x1], 0  ;;  %s1131_s30 = smov 0   ;;  %s1133_s10 = smov 0  }
   0x4   :  { %s1135_s11 = smov 0   ;;  %s1137_s12 = smov 0  }
   0x5 LB: > { %s932_s13 = sadd.s32 4294967295, %s1079_s12   ;;  %s933_s14 = sadd.s32 4294967294, %s1079_s12   ;;  %s1079_s12 = sphi %s1137_s12, %s1415_s12   ;;  %s1075_s11 = sphi %s1135_s11, %s1414_s11   ;;  %s1071_s10 = sphi %s1133_s10, %s1413_s10   ;;  %s1067_s30 = sphi %s1131_s30, %s1412_s30  }
   0x6   : > { %s1154_s15 = sadd.s32 1, %s1079_s12   ;;  %s233_s16 = sadd.s32 1, %s1075_s11 }
   0x7   : > { %s230_s17 = ssub.s32 %s1079_s12, %s1154_s15  ;;  %p243_p0 = scmp.ne.s32.totalorder %s1075_s11, %s1071_s10 }
   0x8   : > { %p231_p1 = scmp.eq.s32.totalorder %s230_s17, 0  ;;  %p244_p2 = scmp.eq.s32.totalorder %s932_s13, 1 }
   0x9   : > { %p249_p3 = scmp.ne.s32.totalorder %s1071_s10, %s1067_s30  ;;  %p250_p4 = scmp.eq.s32.totalorder %s933_s14, 1 }
   0xa   : > { %s1164_s18 = scalar_select %p231_p1, %s1075_s11, %s233_s16  }
   0xb   : > { %p1166_p5 = por %p244_p2, %p243_p0  ;;  %p1170_p6 = por %p250_p4, %p249_p3 }
   0xc   : > { %p936_p7 = scmp.ge.s32.totalorder %s1079_s12, 1  ;;  %p315_p8 = scmp.lt.s32.totalorder %s1079_s12, 3 }
   0xe   : > { %p316_p9 = pnand %p936_p7, %p315_p8 }
   0xf   : > { %s1185_s27 = sshll.u32 (!%p316_p9), %s932_s13, 3  ;;  %s1411_s0 = sld [smem:[#allocation5_spill]] (!%p316_p9) }
  0x10   : > { %319 = sbr.rel (%p316_p9) target bundleno = 378 (0x17a), region = 56  ;;  %p364_p10 = scmp.lt.s32.totalorder (!%p316_p9), %s1185_s27, 15 }
  0x11   : > { %s360_s28 = sand.u32 (!%p316_p9), 1, %s1071_s10   ;;  %s845_s16 = scalar_lea.hbm (!%p316_p9), %s1407_s9, %s1185_s27 }
  0x15   : > { %v627_v0 = vld [vmem:[%s1403_s5 + $0x10] sm:$0xff]  ;;  %v490_v1 = vld [vmem:[%s1401_s3 + $0x18] sm:$0xff]  ;;  %v626_v2 = vld [vmem:[%s1403_s5 + $0x8] sm:$0xff]  ;;  %s365_s25 = scalar_select %p364_p10, %s1185_s27, 15  ;;  %vm559_vm0 = vcmask 261120   ;;  %vm493_vm1 = vcmask 130048  }
  0x16   : > { %666 = vmatpush.msra.mxu2 %v627_v0  ;;  %596 = vmatpush.msra.mxu1 %v490_v1  ;;  %v489_v3 = vld [vmem:[%s1401_s3 + $0x10] sm:$0xff]  ;;  %v492_v4 = vld [vmem:[%s1402_s4 + $0x8] sm:$0xff]  ;;  %v625_v5 = vld [vmem:[%s1403_s5] sm:$0xff]  ;;  %vm628_vm2 = vcmask 195584   ;;  %vm798_vm3 = vcmask 1041409   ;;  %vm800_vm4 = vcmask 1042434  }
  0x17   : > { %532 = vmatpush.msra.mxu0 %v492_v4  ;;  %v488_v6 = vld [vmem:[%s1401_s3 + $0x8] sm:$0xff]  ;;  %v491_v7 = vld [vmem:[%s1402_s4] sm:$0xff]  ;;  %s975_s29 = sshll.u32 %s365_s25, 5  ;;  %s974_s14 = sshll.u32 %s365_s25, 4  ;;  %vm802_vm5 = vcmask 1043459   ;;  %vm804_vm6 = vcmask 1044484  }
  0x18   : > { %667 = vmatpush.msra.mxu2 %v626_v2  ;;  %597 = vmatpush.msra.mxu1 %v489_v3  ;;  %v487_v8 = vld [vmem:[%s1401_s3] sm:$0xff]  ;;  %s1210_s21 = scalar_lea.vmem %s1400_s2, %s975_s29  ;;  %s1215_s23 = scalar_lea.vmem %s1399_s1, %s974_s14  ;;  %vm806_vm7 = vcmask 1045509   ;;  %vm808_vm8 = vcmask 1046534   ;;  %vm810_vm9 = vcmask 1047559  }
  0x19   : > { %533 = vmatpush.msra.mxu0 %v491_v7  ;;  %v415_v9 = vld [vmem:[%s1210_s21] sm:$0xff]  ;;  %v423_v10 = vld [vmem:[%s1210_s21 + $0x8] sm:$0xff]  ;;  %v439_v11 = vld [vmem:[%s1210_s21 + $0x10] sm:$0xff]  ;;  %s939_s24 = sshll.u32 %s365_s25, 3  ;;  %s1037_s14 = scalar_lea.hbm %s1407_s9, 16 }
  0x1a   : > { %668 = vmatpush.msra.mxu2 %v625_v5  ;;  %598 = vmatpush.msra.mxu1 %v488_v6  ;;  %v431_v12 = vadd.f32 %v423_v10, %v415_v9  ;;  %v455_v13 = vld [vmem:[%s1210_s21 + $0x18] sm:$0xff]  ;;  %v383_v14 = vld [vmem:[%s1215_s23] sm:$0xff]  ;;  %v391_v15 = vld [vmem:[%s1215_s23 + $0x8] sm:$0xff]  ;;  %s1226_s29 = scalar_lea.vmem %s1411_s0, %s939_s24  ;;  %s835_s24 = scalar_lea.sflag [#allocation3], %s360_s28 }
  0x1b   : > { %v399_v16 = vadd.f32 %v391_v15, %v383_v14  ;;  %v479_v17 = vld [vmem:[%s1226_s29] sm:$0xff]  ;;  %v424_v19 = vld [vmem:[%s1210_s21 + $0x28] sm:$0xff]  ;;  %v440_v22 = vld [vmem:[%s1210_s21 + $0x30] sm:$0xff] }
  0x1c   : > { %599 = vmatpush.msra.mxu1 %v487_v8  ;;  %v416_v18 = vld [vmem:[%s1210_s21 + $0x20] sm:$0xff]  ;;  %v447_v20 = vadd.f32 %v439_v11, %v431_v12  ;;  %v384_v23 = vld [vmem:[%s1215_s23 + $0x10] sm:$0xff]  ;;  %v392_v25 = vld [vmem:[%s1215_s23 + $0x18] sm:$0xff] }
  0x1d   : > { %954 = vmatmul.msk.f32.vlgmr.msra.gmra.mxu1 %vm559_vm0, %v479_v17  ;;  %v432_v21 = vadd.f32 %v424_v19, %v416_v18  ;;  %v407_v24 = vmul.f32 0.5, %v399_v16  ;;  %v456_v28 = vld [vmem:[%s1210_s21 + $0x38] sm:$0xff]  ;;  %v400_v29 = vadd.f32 %v392_v25, %v384_v23  ;;  %v417_v30 = vld [vmem:[%s1210_s21 + $0x40] sm:$0xff]  ;;  %v425_v31 = vld [vmem:[%s1210_s21 + $0x48] sm:$0xff] }
  0x1e   : > { %v463_v26 = vadd.f32 %v455_v13, %v447_v20  ;;  %v480_v33 = vld [vmem:[%s1226_s29 + $0x8] sm:$0xff]  ;;  %v433_v35 = vadd.f32 %v425_v31, %v417_v30  ;;  %v441_v37 = vld [vmem:[%s1210_s21 + $0x50] sm:$0xff]  ;;  %v385_v38 = vld [vmem:[%s1215_s23 + $0x20] sm:$0xff] }
  0x1f   : > { %v448_v27 = vadd.f32 %v440_v22, %v432_v21  ;;  %946 = vmatmul.msk.f32.vlgmr.msra.gmra.mxu0 %vm493_vm1, %v407_v24  ;;  %v408_v36 = vmul.f32 0.5, %v400_v29  ;;  %v393_v39 = vld [vmem:[%s1215_s23 + $0x28] sm:$0xff]  ;;  %v457_v42 = vld [vmem:[%s1210_s21 + $0x58] sm:$0xff]  ;;  %v418_v44 = vld [vmem:[%s1210_s21 + $0x60] sm:$0xff] }
  0x20   : > { %v471_v32 = vmul.f32 0.25, %v463_v26  ;;  %v449_v41 = vadd.f32 %v441_v37, %v433_v35  ;;  %v401_v43 = vadd.f32 %v393_v39, %v385_v38  ;;  %v426_v45 = vld [vmem:[%s1210_s21 + $0x68] sm:$0xff]  ;;  %v481_v46 = vld [vmem:[%s1226_s29 + $0x10] sm:$0xff]  ;;  %v394_v52 = vld [vmem:[%s1215_s23 + $0x38] sm:$0xff] }
  0x21   : > { %v464_v34 = vadd.f32 %v456_v28, %v448_v27  ;;  %v434_v48 = vadd.f32 %v426_v45, %v418_v44  ;;  %v442_v50 = vld [vmem:[%s1210_s21 + $0x70] sm:$0xff]  ;;  %v458_v55 = vld [vmem:[%s1210_s21 + $0x78] sm:$0xff]  ;;  %v419_v57 = vld [vmem:[%s1210_s21 + $0x80] sm:$0xff] }
  0x22   : > { %962 = vmatmul.msk.f32.vlgmr.msra.gmra.mxu2 %vm628_vm2, %v471_v32  ;;  %v465_v47 = vadd.f32 %v457_v42, %v449_v41  ;;  %v409_v49 = vmul.f32 0.5, %v401_v43  ;;  %v386_v51 = vld [vmem:[%s1215_s23 + $0x30] sm:$0xff]  ;;  %v427_v58 = vld [vmem:[%s1210_s21 + $0x88] sm:$0xff]  ;;  %v482_v59 = vld [vmem:[%s1226_s29 + $0x18] sm:$0xff] }
  0x23   : > { %v472_v40 = vmul.f32 0.25, %v464_v34  ;;  %v450_v54 = vadd.f32 %v442_v50, %v434_v48  ;;  %v402_v56 = vadd.f32 %v394_v52, %v386_v51  ;;  %v435_v61 = vadd.f32 %v427_v58, %v419_v57  ;;  %v443_v63 = vld [vmem:[%s1210_s21 + $0x90] sm:$0xff]  ;;  %v387_v0 = vld [vmem:[%s1215_s23 + $0x40] sm:$0xff]  ;;  %v395_v1 = vld [vmem:[%s1215_s23 + $0x48] sm:$0xff] }
  0x24   : > { %v473_v53 = vmul.f32 0.25, %v465_v47  ;;  %v459_v4 = vld [vmem:[%s1210_s21 + $0x98] sm:$0xff]  ;;  %v403_v5 = vadd.f32 %v395_v1, %v387_v0  ;;  %v420_v6 = vld [vmem:[%s1210_s21 + $0xa0] sm:$0xff]  ;;  %v428_v7 = vld [vmem:[%s1210_s21 + $0xa8] sm:$0xff] }
  0x25   : > { %955 = vmatmul.msk.f32.gmra.mxu1 %vm559_vm0, %v480_v33  ;;  %v466_v60 = vadd.f32 %v458_v55, %v450_v54  ;;  %v410_v62 = vmul.f32 0.5, %v402_v56  ;;  %v451_v3 = vadd.f32 %v443_v63, %v435_v61  ;;  %v483_v8 = vld [vmem:[%s1226_s29 + $0x20] sm:$0xff]  ;;  %v436_v10 = vadd.f32 %v428_v7, %v420_v6  ;;  %v444_v12 = vld [vmem:[%s1210_s21 + $0xb0] sm:$0xff]  ;;  %v396_v14 = vld [vmem:[%s1215_s23 + $0x58] sm:$0xff] }
  0x26   : > { %v411_v11 = vmul.f32 0.5, %v403_v5  ;;  %v388_v13 = vld [vmem:[%s1215_s23 + $0x50] sm:$0xff]  ;;  %v460_v17 = vld [vmem:[%s1210_s21 + $0xb8] sm:$0xff]  ;;  %v421_v19 = vld [vmem:[%s1210_s21 + $0xc0] sm:$0xff] }
  0x27   : > { %947 = vmatmul.msk.f32.gmra.mxu0 %vm493_vm1, %v408_v36  ;;  %v474_v2 = vmul.f32 0.25, %v466_v60  ;;  %v467_v9 = vadd.f32 %v459_v4, %v451_v3  ;;  %v452_v16 = vadd.f32 %v444_v12, %v436_v10  ;;  %v404_v18 = vadd.f32 %v396_v14, %v388_v13  ;;  %v429_v20 = vld [vmem:[%s1210_s21 + $0xc8] sm:$0xff]  ;;  %v445_v25 = vld [vmem:[%s1210_s21 + $0xd0] sm:$0xff]  ;;  %v389_v26 = vld [vmem:[%s1215_s23 + $0x60] sm:$0xff] }
  0x28   : > { %v484_v21 = vld [vmem:[%s1226_s29 + $0x28] sm:$0xff]  ;;  %v437_v23 = vadd.f32 %v429_v20, %v421_v19  ;;  %v461_v30 = vld [vmem:[%s1210_s21 + $0xd8] sm:$0xff]  ;;  %v422_v32 = vld [vmem:[%s1210_s21 + $0xe0] sm:$0xff] }
  0x29   : > { %v475_v15 = vmul.f32 0.25, %v467_v9  ;;  %v468_v22 = vadd.f32 %v460_v17, %v452_v16  ;;  %v412_v24 = vmul.f32 0.5, %v404_v18  ;;  %v397_v27 = vld [vmem:[%s1215_s23 + $0x68] sm:$0xff]  ;;  %v485_v34 = vld [vmem:[%s1226_s29 + $0x30] sm:$0xff]  ;;  %v462_v43 = vld [vmem:[%s1210_s21 + $0xf8] sm:$0xff] }
  0x2a   : > { %963 = vmatmul.msk.f32.gmra.mxu2 %vm628_vm2, %v472_v40  ;;  %v453_v29 = vadd.f32 %v445_v25, %v437_v23  ;;  %v405_v31 = vadd.f32 %v397_v27, %v389_v26  ;;  %v430_v33 = vld [vmem:[%s1210_s21 + $0xe8] sm:$0xff]  ;;  %v446_v38 = vld [vmem:[%s1210_s21 + $0xf0] sm:$0xff]  ;;  %v398_v40 = vld [vmem:[%s1215_s23 + $0x78] sm:$0xff] }
  0x2b   : > { %v476_v28 = vmul.f32 0.25, %v468_v22  ;;  %v438_v36 = vadd.f32 %v430_v33, %v422_v32  ;;  %v390_v39 = vld [vmem:[%s1215_s23 + $0x70] sm:$0xff]  ;;  %v486_v45 = vld [vmem:[%s1226_s29 + $0x38] sm:$0xff]  ;;  %v782_v63 = vld [vmem:[%s1405_s7 + $0x60] sm:$0xff]  ;;  %s937_s29 = sshll.u32 %s360_s28, 3  ;;  %s849_s23 = sshll.u32 %s845_s16, 4  ;;  %s850_s23 = int_to_ptr.hbm [resolvable:$true] %s849_s23 }
  0x2c   : > { %v469_v35 = vadd.f32 %v461_v30, %v453_v29  ;;  %v413_v37 = vmul.f32 0.5, %v405_v31  ;;  %v406_v44 = vadd.f32 %v398_v40, %v390_v39  ;;  %v785_v58 = vld [vmem:[%s1405_s7 + $0x78] sm:$0xff]  ;;  %v779_v5 = vld [vmem:[%s1405_s7 + $0x48] sm:$0xff]  ;;  %v778_v6 = vld [vmem:[%s1405_s7 + $0x40] sm:$0xff]  ;;  %s362_s13 = scalar_lea.vmem [#allocation2], %s937_s29  ;;  %s1031_s26 = sshra.s32 %s850_s23, 4  ;;  %s1032_s26 = int_to_ptr.hbm [resolvable:$true] %s1031_s26 }
  0x2d   : > { %956 = vmatmul.msk.f32.gmra.mxu1 %vm559_vm0, %v481_v46  ;;  %v454_v42 = vadd.f32 %v446_v38, %v438_v36  ;;  %813 = vmatpush.msra.mxu3 %v785_v58  ;;  %v781_v1 = vld [vmem:[%s1405_s7 + $0x58] sm:$0xff]  ;;  %v775_v17 = vld [vmem:[%s1405_s7 + $0x28] sm:$0xff]  ;;  %v774_v20 = vld [vmem:[%s1405_s7 + $0x20] sm:$0xff]  ;;  %s847_s22 = sshll.u32 %s362_s13, 4  ;;  %s1033_s0 = scalar_lea.hbm %s1032_s26, 8  ;;  %s848_s22 = int_to_ptr.vmem [resolvable:$true] %s847_s22 }
  0x2e   : > { %v477_v41 = vmul.f32 0.25, %v469_v35  ;;  %v414_v47 = vmul.f32 0.5, %v406_v44  ;;  %v777_v7 = vld [vmem:[%s1405_s7 + $0x38] sm:$0xff]  ;;  %v1341_v22 = vld [vmem:[%s1404_s6] ss:$0 sm:$0xff]  ;;  %v772_v26 = vld [vmem:[%s1405_s7 + $0x10] sm:$0xff]  ;;  %p1034_p11 = scmp.ne.s32.totalorder %s1032_s26, %s1033_s0  ;;  %p1038_p0 = scmp.lt.s32.totalorder %s1032_s26, %s1407_s9 }
  0x2f   : > { %948 = vmatmul.msk.f32.gmra.mxu0 %vm493_vm1, %v409_v49  ;;  %v470_v46 = vadd.f32 %v462_v43, %v454_v42  ;;  %v771_v30 = vld [vmem:[%s1405_s7 + $0x8] sm:$0xff]  ;;  %p1039_p1 = scmp.lt.s32.totalorder %s1037_s14, %s1033_s0 }
  0x30   : > { %p1035_p12 = pnand %p1034_p11, %p1166_p5 }
  0x31   : > { %v478_v48 = vmul.f32 0.25, %v470_v46  ;;  %p1040_p2 = por %p1039_p1, %p1038_p0 }
  0x32   : > { %964 = vmatmul.msk.f32.gmra.mxu2 %vm628_vm2, %v473_v53  ;;  %p1036_p13 = pneg %p1035_p12 }
  0x34   : > { %p1041_p3 = pnand %p1040_p2, %p1036_p13 }
  0x35   : > { %957 = vmatmul.msk.f32.gmra.mxu1 %vm559_vm0, %v482_v59  ;;  %v784_v59 = vld [vmem:[%s1405_s7 + $0x70] sm:$0xff] }
  0x36   : > { %814 = vmatpush.msra.mxu3 %v784_v59 }
  0x37   : > { %949 = vmatmul.msk.f32.gmra.mxu0 %vm493_vm1, %v410_v62  ;;  %v783_v62 = vld [vmem:[%s1405_s7 + $0x68] sm:$0xff] }
  0x38   : > { %815 = vmatpush.msra.mxu3 %v783_v62 }
  0x3a   : > { %965 = vmatmul.msk.f32.gmra.mxu2 %vm628_vm2, %v474_v2  ;;  %816 = vmatpush.msra.mxu3 %v782_v63  ;;  %v780_v2 = vld [vmem:[%s1405_s7 + $0x50] sm:$0xff] }
  0x3c   : > { %817 = vmatpush.msra.mxu3 %v781_v1 }
  0x3d   : > { %958 = vmatmul.msk.f32.gmra.mxu1 %vm559_vm0, %v483_v8 }
  0x3e   : > { %818 = vmatpush.msra.mxu3 %v780_v2 }
  0x3f   : > { %950 = vmatmul.msk.f32.gmra.mxu0 %vm493_vm1, %v411_v11  ;;  %v776_v11 = vld [vmem:[%s1405_s7 + $0x30] sm:$0xff] }
  0x40   : > { %819 = vmatpush.msra.mxu3 %v779_v5 }
  0x42   : > { %966 = vmatmul.msk.f32.gmra.mxu2 %vm628_vm2, %v475_v15  ;;  %820 = vmatpush.msra.mxu3 %v778_v6 }
  0x44   : > { %821 = vmatpush.msra.mxu3 %v777_v7 }
  0x45   : > { %959 = vmatmul.msk.f32.gmra.mxu1 %vm559_vm0, %v484_v21 }
  0x46   : > { %822 = vmatpush.msra.mxu3 %v776_v11 }
  0x47   : > { %951 = vmatmul.msk.f32.gmra.mxu0 %vm493_vm1, %v412_v24  ;;  %v773_v24 = vld [vmem:[%s1405_s7 + $0x18] sm:$0xff] }
  0x48   : > { %823 = vmatpush.msra.mxu3 %v775_v17 }
  0x4a   : > { %967 = vmatmul.msk.f32.gmra.mxu2 %vm628_vm2, %v476_v28  ;;  %824 = vmatpush.msra.mxu3 %v774_v20 }
  0x4c   : > { %825 = vmatpush.msra.mxu3 %v773_v24 }
  0x4d   : > { %960 = vmatmul.msk.f32.gmra.mxu1 %vm559_vm0, %v485_v34 }
  0x4e   : > { %826 = vmatpush.msra.mxu3 %v772_v26 }
  0x4f   : > { %952 = vmatmul.msk.f32.gmra.mxu0 %vm493_vm1, %v413_v37  ;;  %v770_v37 = vld [vmem:[%s1405_s7] sm:$0xff] }
  0x50   : > { %827 = vmatpush.msra.mxu3 %v771_v30 }
  0x52   : > { %968 = vmatmul.msk.f32.gmra.mxu2 %vm628_vm2, %v477_v41  ;;  %828 = vmatpush.msra.mxu3 %v770_v37 }
  0x55   : > { %961 = vmatmul.msk.f32.gmra.mxu1 %vm559_vm0, %v486_v45 }
  0x57   : > { %953 = vmatmul.msk.f32.gmra.mxu0 %vm493_vm1, %v414_v47 }
  0x5a   : > { %969 = vmatmul.msk.f32.gmra.mxu2 %vm628_vm2, %v478_v48 }
  0x9a   : > { %v601_v49 = vpop.f32.mrf.mxu1 }
  0x9c   : > { %v535_v50 = vpop.f32.mrf.mxu0 }
  0x9d   : > { %v602_v12 = vadd.f32 %v601_v49, %v535_v50 }
  0xa2   : > { %v604_v51 = vpop.f32.mrf.mxu1 }
  0xa4   : > { %v538_v52 = vpop.f32.mrf.mxu0 }
  0xa5   : > { %v670_v53 = vpop.f32.mrf.mxu2  ;;  %v605_v8 = vadd.f32 %v604_v51, %v538_v52 }
  0xa6   : > { %v694_v21 = vadd.f32 %v670_v53, %v602_v12 }
  0xa8   : > { %v706_v31 = vadd.f32 %v1341_v22, %v694_v21 }
  0xaa   : > { %v607_v54 = vpop.f32.mrf.mxu1  ;;  %v714_v41 = vmax.f32 %v706_v31, 0.0 }
  0xac   : > { %v541_v55 = vpop.f32.mrf.mxu0  ;;  %v722_v49 = vrot.slane %v714_v41, 4 }
  0xad   : > { %v673_v56 = vpop.f32.mrf.mxu2  ;;  %v608_v10 = vadd.f32 %v607_v54, %v541_v55 }
  0xae   : > { %v695_v18 = vadd.f32 %v673_v56, %v605_v8  ;;  %v723_v59 = vadd.f32 %v722_v49, %v714_v41  ;;  %v1016_v49 = vld [vmem:[%s1406_s8] ss:$0 sm:$0xff] }
  0xb0   : > { %v707_v27 = vadd.f32 %v1341_v22, %v695_v18 }
  0xb2   : > { %v610_v57 = vpop.f32.mrf.mxu1  ;;  %v715_v38 = vmax.f32 %v707_v27, 0.0 }
  0xb4   : > { %v544_v60 = vpop.f32.mrf.mxu0  ;;  %v728_v45 = vrot.slane %v715_v38, 4 }
  0xb5   : > { %v676_v61 = vpop.f32.mrf.mxu2  ;;  %v611_v13 = vadd.f32 %v610_v57, %v544_v60 }
  0xb6   : > { %v696_v19 = vadd.f32 %v676_v61, %v608_v10  ;;  %v729_v53 = vadd.f32 %v728_v45, %v715_v38 }
  0xb8   : > { %v708_v29 = vadd.f32 %v1341_v22, %v696_v19  ;;  %v730_v63 = vrot.slane %v729_v53, 2 }
  0xba   : > { %v613_v0 = vpop.f32.mrf.mxu1  ;;  %v716_v40 = vmax.f32 %v708_v29, 0.0 }
  0xbc   : > { %v547_v3 = vpop.f32.mrf.mxu0  ;;  %v734_v48 = vrot.slane %v716_v40, 4 }
  0xbd   : > { %v679_v4 = vpop.f32.mrf.mxu2  ;;  %v614_v15 = vadd.f32 %v613_v0, %v547_v3 }
  0xbe   : > { %v697_v23 = vadd.f32 %v679_v4, %v611_v13  ;;  %v735_v56 = vadd.f32 %v734_v48, %v716_v40  ;;  %v724_v4 = vrot.slane %v723_v59, 2 }
  0xc0   : > { %v709_v32 = vadd.f32 %v1341_v22, %v697_v23  ;;  %v736_v3 = vrot.slane %v735_v56, 2 }
  0xc2   : > { %v616_v9 = vpop.f32.mrf.mxu1  ;;  %v717_v42 = vmax.f32 %v709_v32, 0.0  ;;  %v737_v13 = vadd.f32 %v736_v3, %v735_v56 }
  0xc4   : > { %v550_v14 = vpop.f32.mrf.mxu0  ;;  %v740_v50 = vrot.slane %v717_v42, 4  ;;  %v738_v23 = vrot.slane %v737_v13, 1 }
  0xc5   : > { %v682_v16 = vpop.f32.mrf.mxu2  ;;  %v617_v28 = vadd.f32 %v616_v9, %v550_v14  ;;  %v731_v9 = vadd.f32 %v730_v63, %v729_v53  ;;  %v725_v14 = vadd.f32 %v724_v4, %v723_v59 }
  0xc6   : > { %v698_v25 = vadd.f32 %v682_v16, %v614_v15  ;;  %v741_v60 = vadd.f32 %v740_v50, %v717_v42  ;;  %v739_v32 = vadd.f32 %v738_v23, %v737_v13 }
  0xc7   : > { %v732_v19 = vrot.slane %v731_v9, 1 }
  0xc8   : > { %v710_v34 = vadd.f32 %v1341_v22, %v698_v25  ;;  %v742_v5 = vrot.slane %v741_v60, 2  ;;  %v726_v25 = vrot.slane %v725_v14, 1 }
  0xc9   : > { %v733_v29 = vadd.f32 %v732_v19, %v731_v9 }
  0xca   : > { %v619_v33 = vpop.f32.mrf.mxu1  ;;  %v718_v44 = vmax.f32 %v710_v34, 0.0  ;;  %v743_v15 = vadd.f32 %v742_v5, %v741_v60  ;;  %v727_v34 = vadd.f32 %v726_v25, %v725_v14 }
  0xcc   : > { %v553_v36 = vpop.f32.mrf.mxu0  ;;  %v746_v51 = vrot.slane %v718_v44, 4  ;;  %v744_v26 = vrot.slane %v743_v15, 1  ;;  %v799_v37 = vsel %vm798_vm3, %v733_v29, %v727_v34 }
  0xcd   : > { %v685_v35 = vpop.f32.mrf.mxu2  ;;  %v620_v47 = vadd.f32 %v619_v33, %v553_v36  ;;  %v801_v41 = vsel %vm800_vm4, %v739_v32, %v799_v37 }
  0xce   : > { %v699_v39 = vadd.f32 %v685_v35, %v617_v28  ;;  %v747_v62 = vadd.f32 %v746_v51, %v718_v44  ;;  %v745_v35 = vadd.f32 %v744_v26, %v743_v15 }
  0xd0   : > { %v711_v43 = vadd.f32 %v1341_v22, %v699_v39  ;;  %v748_v7 = vrot.slane %v747_v62, 2 }
  0xd2   : > { %v719_v46 = vmax.f32 %v711_v43, 0.0  ;;  %v622_v58 = vpop.f32.mrf.mxu1  ;;  %v749_v18 = vadd.f32 %v748_v7, %v747_v62  ;;  %v803_v43 = vsel %vm802_vm5, %v745_v35, %v801_v41 }
  0xd4   : > { %v752_v54 = vrot.slane %v719_v46, 4  ;;  %v556_v57 = vpop.f32.mrf.mxu0  ;;  %v750_v28 = vrot.slane %v749_v18, 1 }
  0xd5   : > { %v688_v52 = vpop.f32.mrf.mxu2  ;;  %v623_v2 = vadd.f32 %v622_v58, %v556_v57 }
  0xd6   : > { %v700_v55 = vadd.f32 %v688_v52, %v620_v47  ;;  %v753_v0 = vadd.f32 %v752_v54, %v719_v46 }
  0xd8   : > { %v712_v61 = vadd.f32 %v1341_v22, %v700_v55  ;;  %v754_v10 = vrot.slane %v753_v0, 2 }
  0xda   : > { %v720_v1 = vmax.f32 %v712_v61, 0.0  ;;  %v755_v20 = vadd.f32 %v754_v10, %v753_v0 }
  0xdc   : > { %v758_v6 = vrot.slane %v720_v1, 4  ;;  %v756_v30 = vrot.slane %v755_v20, 1 }
  0xdd   : > { %v691_v8 = vpop.f32.mrf.mxu2 }
  0xde   : > { %v759_v11 = vadd.f32 %v758_v6, %v720_v1  ;;  %v701_v12 = vadd.f32 %v691_v8, %v623_v2  ;;  %v757_v38 = vadd.f32 %v756_v30, %v755_v20 }
  0xe0   : > { %v760_v16 = vrot.slane %v759_v11, 2  ;;  %v713_v17 = vadd.f32 %v1341_v22, %v701_v12  ;;  %v751_v22 = vadd.f32 %v750_v28, %v749_v18 }
  0xe2   : > { %v721_v21 = vmax.f32 %v713_v17, 0.0  ;;  %v761_v24 = vadd.f32 %v760_v16, %v759_v11  ;;  %v805_v44 = vsel %vm804_vm6, %v751_v22, %v803_v43 }
  0xe3   : > { %v807_v46 = vsel %vm806_vm7, %v757_v38, %v805_v44 }
  0xe4   : > { %v764_v27 = vrot.slane %v721_v21, 4  ;;  %v762_v33 = vrot.slane %v761_v24, 1 }
  0xe6   : > { %v765_v31 = vadd.f32 %v764_v27, %v721_v21  ;;  %v763_v40 = vadd.f32 %v762_v33, %v761_v24 }
  0xe8   : > { %v766_v36 = vrot.slane %v765_v31, 2  ;;  %v809_v47 = vsel %vm808_vm8, %v763_v40, %v807_v46 }
  0xea   : > { %v767_v39 = vadd.f32 %v766_v36, %v765_v31 }
  0xec   : > { %v768_v42 = vrot.slane %v767_v39, 1 }
  0xee   : > { %v769_v45 = vadd.f32 %v768_v42, %v767_v39 }
  0xf0   : > { %v811_v48 = vsel %vm810_vm9, %v769_v45, %v809_v47 }
  0xf1   : > { %829 = vmatmul.f32.vlgmr.msra.gmra.mxu3 %v811_v48 }
 0x174   : > { %v830_v50 = vpop.f32.mrf.mxu3 }
 0x175   : > { %v831_v51 = vadd.f32 %v1016_v49, %v830_v50 }
 0x177   : > { %833 = vst [vmem:[%s362_s13] sm:$0xff] %v831_v51 }
 0x178   : > { %1044 = shalt.err (!%p1041_p3)
}
 0x179   : > { %976 = dma.vmem_to_hbm [thread:$0]  (%p1166_p5), %s848_s22, 128, %s850_s23, %s835_s24  }
 0x17a PF: > { %p982_p4 = scmp.ge.s32.totalorder %s1079_s12, 2  ;;  %s861_s28 = sand.u32 1, %s1067_s30  }
 0x17b   : > { %s862_s16 = scalar_lea.sflag [#allocation3], %s861_s28 }
 0x17c   : > { %p979_p7 = pnand %p982_p4, %p1170_p6 }
 0x17e   : > { %p980_p8 = pneg %p979_p7 }
 0x180   : > { %1062 = dma.done.wait (%p980_p8), %s862_s16, 128  }
 0x181   : > { %1064 = vsyncadd (%p980_p8), %s862_s16, 4294967168  ;;  %p19_p9 = scmp.ge.s32.totalorder %s1154_s15, 4   ;;  %s1412_s30 = smov %s1071_s10 }
 0x182   : > { %s1413_s10 = smov %s1075_s11  ;;  %s1414_s11 = smov %s1164_s18 }
 0x183   : > { %s1415_s12 = smov %s1154_s15  ;;  %21 = sbr.rel (!%p19_p9) target bundleno = 5 (0x5), region = 97 }
 0x188   :  { %868 = vsyncpa [#allocation3], 1 }
 0x189   :  { %870 = vsyncpa [#allocation3 + $0x1], 1 }

// kernel: tpu_custom_call.1
= control target key start
LH: loop header
LB: loop body
LE: loop exit
PB: predicated region body
PF: predicated region fallthrough
CT: control target
= control target key end

     0   :  { %s1398_s0 = inlined_call_operand.vmem [shape: f32[16,8,32], index: 0, kind: input, shape index: {}]   ;;  %s1399_s1 = inlined_call_operand.vmem [shape: f32[16,16,16], index: 1, kind: input, shape index: {}]   ;;  %s1400_s2 = inlined_call_operand.vmem [shape: f32[16,32,24], index: 2, kind: input, shape index: {}]   ;;  %s1401_s3 = inlined_call_operand.vmem [shape: f32[32,128], index: 3, kind: input, shape index: {}]   ;;  %s1402_s4 = inlined_call_operand.vmem [shape: f32[16,128], index: 4, kind: input, shape index: {}]   ;;  %s1403_s5 = inlined_call_operand.vmem [shape: f32[24,128], index: 5, kind: input, shape index: {}]   ;;  %s1404_s6 = inlined_call_operand.vmem [shape: f32[1,128], index: 6, kind: input, shape index: {}]   ;;  %s1405_s7 = inlined_call_operand.vmem [shape: f32[128,128], index: 7, kind: input, shape index: {}]   ;;  %s1406_s8 = inlined_call_operand.vmem [shape: f32[1,128], index: 8, kind: input, shape index: {}]   ;;  %s1407_s9 = inlined_call_operand.hbm [shape: f32[16,128], index: 9, kind: output, shape index: {}]  }
   0x1   :  { %1408 = sst [smem:[#allocation5_spill]] %s1398_s0 }
   0x2   :  { %14 = vsyncpa [#allocation3], 0 }
   0x3   :  { %16 = vsyncpa [#allocation3 + $0x1], 0  ;;  %s1131_s30 = smov 0   ;;  %s1133_s10 = smov 0  }
   0x4   :  { %s1135_s11 = smov 0   ;;  %s1137_s12 = smov 0  }
   0x5 LB: > { %s932_s13 = sadd.s32 4294967295, %s1079_s12   ;;  %s933_s14 = sadd.s32 4294967294, %s1079_s12   ;;  %s1079_s12 = sphi %s1137_s12, %s1415_s12   ;;  %s1075_s11 = sphi %s1135_s11, %s1414_s11   ;;  %s1071_s10 = sphi %s1133_s10, %s1413_s10   ;;  %s1067_s30 = sphi %s1131_s30, %s1412_s30  }
   0x6   : > { %s1154_s15 = sadd.s32 1, %s1079_s12   ;;  %s233_s16 = sadd.s32 1, %s1075_s11 }
   0x7   : > { %s230_s17 = ssub.s32 %s1079_s12, %s1154_s15  ;;  %p243_p0 = scmp.ne.s32.totalorder %s1075_s11, %s1071_s10 }
   0x8   : > { %p231_p1 = scmp.eq.s32.totalorder %s230_s17, 0  ;;  %p244_p2 = scmp.eq.s32.totalorder %s932_s13, 1 }
   0x9   : > { %p249_p3 = scmp.ne.s32.totalorder %s1071_s10, %s1067_s30  ;;  %p250_p4 = scmp.eq.s32.totalorder %s933_s14, 1 }
   0xa   : > { %s1164_s18 = scalar_select %p231_p1, %s1075_s11, %s233_s16  }
   0xb   : > { %p1166_p5 = por %p244_p2, %p243_p0  ;;  %p1170_p6 = por %p250_p4, %p249_p3 }
   0xc   : > { %p936_p7 = scmp.ge.s32.totalorder %s1079_s12, 1  ;;  %p315_p8 = scmp.lt.s32.totalorder %s1079_s12, 3 }
   0xe   : > { %p316_p9 = pnand %p936_p7, %p315_p8 }
   0xf   : > { %s1185_s27 = sshll.u32 (!%p316_p9), %s932_s13, 3  ;;  %s1411_s0 = sld [smem:[#allocation5_spill]] (!%p316_p9) }
  0x10   : > { %319 = sbr.rel (%p316_p9) target bundleno = 378 (0x17a), region = 56  ;;  %p364_p10 = scmp.lt.s32.totalorder (!%p316_p9), %s1185_s27, 15 }
  0x11   : > { %s360_s28 = sand.u32 (!%p316_p9), 1, %s1071_s10   ;;  %s845_s16 = scalar_lea.hbm (!%p316_p9), %s1407_s9, %s1185_s27 }
  0x15   : > { %v627_v0 = vld [vmem:[%s1403_s5 + $0x10] sm:$0xff]  ;;  %v490_v1 = vld [vmem:[%s1401_s3 + $0x18] sm:$0xff]  ;;  %v626_v2 = vld [vmem:[%s1403_s5 + $0x8] sm:$0xff]  ;;  %s365_s25 = scalar_select %p364_p10, %s1185_s27, 15  ;;  %vm559_vm0 = vcmask 261120   ;;  %vm493_vm1 = vcmask 130048  }
  0x16   : > { %666 = vmatpush.msra.mxu2 %v627_v0  ;;  %596 = vmatpush.msra.mxu1 %v490_v1  ;;  %v489_v3 = vld [vmem:[%s1401_s3 + $0x10] sm:$0xff]  ;;  %v492_v4 = vld [vmem:[%s1402_s4 + $0x8] sm:$0xff]  ;;  %v625_v5 = vld [vmem:[%s1403_s5] sm:$0xff]  ;;  %vm628_vm2 = vcmask 195584   ;;  %vm798_vm3 = vcmask 1041409   ;;  %vm800_vm4 = vcmask 1042434  }
  0x17   : > { %532 = vmatpush.msra.mxu0 %v492_v4  ;;  %v488_v6 = vld [vmem:[%s1401_s3 + $0x8] sm:$0xff]  ;;  %v491_v7 = vld [vmem:[%s1402_s4] sm:$0xff]  ;;  %s975_s29 = sshll.u32 %s365_s25, 5  ;;  %s974_s14 = sshll.u32 %s365_s25, 4  ;;  %vm802_vm5 = vcmask 1043459   ;;  %vm804_vm6 = vcmask 1044484  }
  0x18   : > { %667 = vmatpush.msra.mxu2 %v626_v2  ;;  %597 = vmatpush.msra.mxu1 %v489_v3  ;;  %v487_v8 = vld [vmem:[%s1401_s3] sm:$0xff]  ;;  %s1210_s21 = scalar_lea.vmem %s1400_s2, %s975_s29  ;;  %s1215_s23 = scalar_lea.vmem %s1399_s1, %s974_s14  ;;  %vm806_vm7 = vcmask 1045509   ;;  %vm808_vm8 = vcmask 1046534   ;;  %vm810_vm9 = vcmask 1047559  }
  0x19   : > { %533 = vmatpush.msra.mxu0 %v491_v7  ;;  %v415_v9 = vld [vmem:[%s1210_s21] sm:$0xff]  ;;  %v423_v10 = vld [vmem:[%s1210_s21 + $0x8] sm:$0xff]  ;;  %v439_v11 = vld [vmem:[%s1210_s21 + $0x10] sm:$0xff]  ;;  %s939_s24 = sshll.u32 %s365_s25, 3  ;;  %s1037_s14 = scalar_lea.hbm %s1407_s9, 16 }
  0x1a   : > { %668 = vmatpush.msra.mxu2 %v625_v5  ;;  %598 = vmatpush.msra.mxu1 %v488_v6  ;;  %v431_v12 = vadd.f32 %v423_v10, %v415_v9  ;;  %v455_v13 = vld [vmem:[%s1210_s21 + $0x18] sm:$0xff]  ;;  %v383_v14 = vld [vmem:[%s1215_s23] sm:$0xff]  ;;  %v391_v15 = vld [vmem:[%s1215_s23 + $0x8] sm:$0xff]  ;;  %s1226_s29 = scalar_lea.vmem %s1411_s0, %s939_s24  ;;  %s835_s24 = scalar_lea.sflag [#allocation3], %s360_s28 }
  0x1b   : > { %v399_v16 = vadd.f32 %v391_v15, %v383_v14  ;;  %v479_v17 = vld [vmem:[%s1226_s29] sm:$0xff]  ;;  %v424_v19 = vld [vmem:[%s1210_s21 + $0x28] sm:$0xff]  ;;  %v440_v22 = vld [vmem:[%s1210_s21 + $0x30] sm:$0xff] }
  0x1c   : > { %599 = vmatpush.msra.mxu1 %v487_v8  ;;  %v416_v18 = vld [vmem:[%s1210_s21 + $0x20] sm:$0xff]  ;;  %v447_v20 = vadd.f32 %v439_v11, %v431_v12  ;;  %v384_v23 = vld [vmem:[%s1215_s23 + $0x10] sm:$0xff]  ;;  %v392_v25 = vld [vmem:[%s1215_s23 + $0x18] sm:$0xff] }
  0x1d   : > { %954 = vmatmul.msk.f32.vlgmr.msra.gmra.mxu1 %vm559_vm0, %v479_v17  ;;  %v432_v21 = vadd.f32 %v424_v19, %v416_v18  ;;  %v407_v24 = vmul.f32 0.5, %v399_v16  ;;  %v456_v28 = vld [vmem:[%s1210_s21 + $0x38] sm:$0xff]  ;;  %v400_v29 = vadd.f32 %v392_v25, %v384_v23  ;;  %v417_v30 = vld [vmem:[%s1210_s21 + $0x40] sm:$0xff]  ;;  %v425_v31 = vld [vmem:[%s1210_s21 + $0x48] sm:$0xff] }
  0x1e   : > { %v463_v26 = vadd.f32 %v455_v13, %v447_v20  ;;  %v480_v33 = vld [vmem:[%s1226_s29 + $0x8] sm:$0xff]  ;;  %v433_v35 = vadd.f32 %v425_v31, %v417_v30  ;;  %v441_v37 = vld [vmem:[%s1210_s21 + $0x50] sm:$0xff]  ;;  %v385_v38 = vld [vmem:[%s1215_s23 + $0x20] sm:$0xff] }
  0x1f   : > { %v448_v27 = vadd.f32 %v440_v22, %v432_v21  ;;  %946 = vmatmul.msk.f32.vlgmr.msra.gmra.mxu0 %vm493_vm1, %v407_v24  ;;  %v408_v36 = vmul.f32 0.5, %v400_v29  ;;  %v393_v39 = vld [vmem:[%s1215_s23 + $0x28] sm:$0xff]  ;;  %v457_v42 = vld [vmem:[%s1210_s21 + $0x58] sm:$0xff]  ;;  %v418_v44 = vld [vmem:[%s1210_s21 + $0x60] sm:$0xff] }
  0x20   : > { %v471_v32 = vmul.f32 0.25, %v463_v26  ;;  %v449_v41 = vadd.f32 %v441_v37, %v433_v35  ;;  %v401_v43 = vadd.f32 %v393_v39, %v385_v38  ;;  %v426_v45 = vld [vmem:[%s1210_s21 + $0x68] sm:$0xff]  ;;  %v481_v46 = vld [vmem:[%s1226_s29 + $0x10] sm:$0xff]  ;;  %v394_v52 = vld [vmem:[%s1215_s23 + $0x38] sm:$0xff] }
  0x21   : > { %v464_v34 = vadd.f32 %v456_v28, %v448_v27  ;;  %v434_v48 = vadd.f32 %v426_v45, %v418_v44  ;;  %v442_v50 = vld [vmem:[%s1210_s21 + $0x70] sm:$0xff]  ;;  %v458_v55 = vld [vmem:[%s1210_s21 + $0x78] sm:$0xff]  ;;  %v419_v57 = vld [vmem:[%s1210_s21 + $0x80] sm:$0xff] }
  0x22   : > { %962 = vmatmul.msk.f32.vlgmr.msra.gmra.mxu2 %vm628_vm2, %v471_v32  ;;  %v465_v47 = vadd.f32 %v457_v42, %v449_v41  ;;  %v409_v49 = vmul.f32 0.5, %v401_v43  ;;  %v386_v51 = vld [vmem:[%s1215_s23 + $0x30] sm:$0xff]  ;;  %v427_v58 = vld [vmem:[%s1210_s21 + $0x88] sm:$0xff]  ;;  %v482_v59 = vld [vmem:[%s1226_s29 + $0x18] sm:$0xff] }
  0x23   : > { %v472_v40 = vmul.f32 0.25, %v464_v34  ;;  %v450_v54 = vadd.f32 %v442_v50, %v434_v48  ;;  %v402_v56 = vadd.f32 %v394_v52, %v386_v51  ;;  %v435_v61 = vadd.f32 %v427_v58, %v419_v57  ;;  %v443_v63 = vld [vmem:[%s1210_s21 + $0x90] sm:$0xff]  ;;  %v387_v0 = vld [vmem:[%s1215_s23 + $0x40] sm:$0xff]  ;;  %v395_v1 = vld [vmem:[%s1215_s23 + $0x48] sm:$0xff] }
  0x24   : > { %v473_v53 = vmul.f32 0.25, %v465_v47  ;;  %v459_v4 = vld [vmem:[%s1210_s21 + $0x98] sm:$0xff]  ;;  %v403_v5 = vadd.f32 %v395_v1, %v387_v0  ;;  %v420_v6 = vld [vmem:[%s1210_s21 + $0xa0] sm:$0xff]  ;;  %v428_v7 = vld [vmem:[%s1210_s21 + $0xa8] sm:$0xff] }
  0x25   : > { %955 = vmatmul.msk.f32.gmra.mxu1 %vm559_vm0, %v480_v33  ;;  %v466_v60 = vadd.f32 %v458_v55, %v450_v54  ;;  %v410_v62 = vmul.f32 0.5, %v402_v56  ;;  %v451_v3 = vadd.f32 %v443_v63, %v435_v61  ;;  %v483_v8 = vld [vmem:[%s1226_s29 + $0x20] sm:$0xff]  ;;  %v436_v10 = vadd.f32 %v428_v7, %v420_v6  ;;  %v444_v12 = vld [vmem:[%s1210_s21 + $0xb0] sm:$0xff]  ;;  %v396_v14 = vld [vmem:[%s1215_s23 + $0x58] sm:$0xff] }
  0x26   : > { %v411_v11 = vmul.f32 0.5, %v403_v5  ;;  %v388_v13 = vld [vmem:[%s1215_s23 + $0x50] sm:$0xff]  ;;  %v460_v17 = vld [vmem:[%s1210_s21 + $0xb8] sm:$0xff]  ;;  %v421_v19 = vld [vmem:[%s1210_s21 + $0xc0] sm:$0xff] }
  0x27   : > { %947 = vmatmul.msk.f32.gmra.mxu0 %vm493_vm1, %v408_v36  ;;  %v474_v2 = vmul.f32 0.25, %v466_v60  ;;  %v467_v9 = vadd.f32 %v459_v4, %v451_v3  ;;  %v452_v16 = vadd.f32 %v444_v12, %v436_v10  ;;  %v404_v18 = vadd.f32 %v396_v14, %v388_v13  ;;  %v429_v20 = vld [vmem:[%s1210_s21 + $0xc8] sm:$0xff]  ;;  %v445_v25 = vld [vmem:[%s1210_s21 + $0xd0] sm:$0xff]  ;;  %v389_v26 = vld [vmem:[%s1215_s23 + $0x60] sm:$0xff] }
  0x28   : > { %v484_v21 = vld [vmem:[%s1226_s29 + $0x28] sm:$0xff]  ;;  %v437_v23 = vadd.f32 %v429_v20, %v421_v19  ;;  %v461_v30 = vld [vmem:[%s1210_s21 + $0xd8] sm:$0xff]  ;;  %v422_v32 = vld [vmem:[%s1210_s21 + $0xe0] sm:$0xff] }
  0x29   : > { %v475_v15 = vmul.f32 0.25, %v467_v9  ;;  %v468_v22 = vadd.f32 %v460_v17, %v452_v16  ;;  %v412_v24 = vmul.f32 0.5, %v404_v18  ;;  %v397_v27 = vld [vmem:[%s1215_s23 + $0x68] sm:$0xff]  ;;  %v485_v34 = vld [vmem:[%s1226_s29 + $0x30] sm:$0xff]  ;;  %v462_v43 = vld [vmem:[%s1210_s21 + $0xf8] sm:$0xff] }
  0x2a   : > { %963 = vmatmul.msk.f32.gmra.mxu2 %vm628_vm2, %v472_v40  ;;  %v453_v29 = vadd.f32 %v445_v25, %v437_v23  ;;  %v405_v31 = vadd.f32 %v397_v27, %v389_v26  ;;  %v430_v33 = vld [vmem:[%s1210_s21 + $0xe8] sm:$0xff]  ;;  %v446_v38 = vld [vmem:[%s1210_s21 + $0xf0] sm:$0xff]  ;;  %v398_v40 = vld [vmem:[%s1215_s23 + $0x78] sm:$0xff] }
  0x2b   : > { %v476_v28 = vmul.f32 0.25, %v468_v22  ;;  %v438_v36 = vadd.f32 %v430_v33, %v422_v32  ;;  %v390_v39 = vld [vmem:[%s1215_s23 + $0x70] sm:$0xff]  ;;  %v486_v45 = vld [vmem:[%s1226_s29 + $0x38] sm:$0xff]  ;;  %v782_v63 = vld [vmem:[%s1405_s7 + $0x60] sm:$0xff]  ;;  %s937_s29 = sshll.u32 %s360_s28, 3  ;;  %s849_s23 = sshll.u32 %s845_s16, 4  ;;  %s850_s23 = int_to_ptr.hbm [resolvable:$true] %s849_s23 }
  0x2c   : > { %v469_v35 = vadd.f32 %v461_v30, %v453_v29  ;;  %v413_v37 = vmul.f32 0.5, %v405_v31  ;;  %v406_v44 = vadd.f32 %v398_v40, %v390_v39  ;;  %v785_v58 = vld [vmem:[%s1405_s7 + $0x78] sm:$0xff]  ;;  %v779_v5 = vld [vmem:[%s1405_s7 + $0x48] sm:$0xff]  ;;  %v778_v6 = vld [vmem:[%s1405_s7 + $0x40] sm:$0xff]  ;;  %s362_s13 = scalar_lea.vmem [#allocation2], %s937_s29  ;;  %s1031_s26 = sshra.s32 %s850_s23, 4  ;;  %s1032_s26 = int_to_ptr.hbm [resolvable:$true] %s1031_s26 }
  0x2d   : > { %956 = vmatmul.msk.f32.gmra.mxu1 %vm559_vm0, %v481_v46  ;;  %v454_v42 = vadd.f32 %v446_v38, %v438_v36  ;;  %813 = vmatpush.msra.mxu3 %v785_v58  ;;  %v781_v1 = vld [vmem:[%s1405_s7 + $0x58] sm:$0xff]  ;;  %v775_v17 = vld [vmem:[%s1405_s7 + $0x28] sm:$0xff]  ;;  %v774_v20 = vld [vmem:[%s1405_s7 + $0x20] sm:$0xff]  ;;  %s847_s22 = sshll.u32 %s362_s13, 4  ;;  %s1033_s0 = scalar_lea.hbm %s1032_s26, 8  ;;  %s848_s22 = int_to_ptr.vmem [resolvable:$true] %s847_s22 }
  0x2e   : > { %v477_v41 = vmul.f32 0.25, %v469_v35  ;;  %v414_v47 = vmul.f32 0.5, %v406_v44  ;;  %v777_v7 = vld [vmem:[%s1405_s7 + $0x38] sm:$0xff]  ;;  %v1341_v22 = vld [vmem:[%s1404_s6] ss:$0 sm:$0xff]  ;;  %v772_v26 = vld [vmem:[%s1405_s7 + $0x10] sm:$0xff]  ;;  %p1034_p11 = scmp.ne.s32.totalorder %s1032_s26, %s1033_s0  ;;  %p1038_p0 = scmp.lt.s32.totalorder %s1032_s26, %s1407_s9 }
  0x2f   : > { %948 = vmatmul.msk.f32.gmra.mxu0 %vm493_vm1, %v409_v49  ;;  %v470_v46 = vadd.f32 %v462_v43, %v454_v42  ;;  %v771_v30 = vld [vmem:[%s1405_s7 + $0x8] sm:$0xff]  ;;  %p1039_p1 = scmp.lt.s32.totalorder %s1037_s14, %s1033_s0 }
  0x30   : > { %p1035_p12 = pnand %p1034_p11, %p1166_p5 }
  0x31   : > { %v478_v48 = vmul.f32 0.25, %v470_v46  ;;  %p1040_p2 = por %p1039_p1, %p1038_p0 }
  0x32   : > { %964 = vmatmul.msk.f32.gmra.mxu2 %vm628_vm2, %v473_v53  ;;  %p1036_p13 = pneg %p1035_p12 }
  0x34   : > { %p1041_p3 = pnand %p1040_p2, %p1036_p13 }
  0x35   : > { %957 = vmatmul.msk.f32.gmra.mxu1 %vm559_vm0, %v482_v59  ;;  %v784_v59 = vld [vmem:[%s1405_s7 + $0x70] sm:$0xff] }
  0x36   : > { %814 = vmatpush.msra.mxu3 %v784_v59 }
  0x37   : > { %949 = vmatmul.msk.f32.gmra.mxu0 %vm493_vm1, %v410_v62  ;;  %v783_v62 = vld [vmem:[%s1405_s7 + $0x68] sm:$0xff] }
  0x38   : > { %815 = vmatpush.msra.mxu3 %v783_v62 }
  0x3a   : > { %965 = vmatmul.msk.f32.gmra.mxu2 %vm628_vm2, %v474_v2  ;;  %816 = vmatpush.msra.mxu3 %v782_v63  ;;  %v780_v2 = vld [vmem:[%s1405_s7 + $0x50] sm:$0xff] }
  0x3c   : > { %817 = vmatpush.msra.mxu3 %v781_v1 }
  0x3d   : > { %958 = vmatmul.msk.f32.gmra.mxu1 %vm559_vm0, %v483_v8 }
  0x3e   : > { %818 = vmatpush.msra.mxu3 %v780_v2 }
  0x3f   : > { %950 = vmatmul.msk.f32.gmra.mxu0 %vm493_vm1, %v411_v11  ;;  %v776_v11 = vld [vmem:[%s1405_s7 + $0x30] sm:$0xff] }
  0x40   : > { %819 = vmatpush.msra.mxu3 %v779_v5 }
  0x42   : > { %966 = vmatmul.msk.f32.gmra.mxu2 %vm628_vm2, %v475_v15  ;;  %820 = vmatpush.msra.mxu3 %v778_v6 }
  0x44   : > { %821 = vmatpush.msra.mxu3 %v777_v7 }
  0x45   : > { %959 = vmatmul.msk.f32.gmra.mxu1 %vm559_vm0, %v484_v21 }
  0x46   : > { %822 = vmatpush.msra.mxu3 %v776_v11 }
  0x47   : > { %951 = vmatmul.msk.f32.gmra.mxu0 %vm493_vm1, %v412_v24  ;;  %v773_v24 = vld [vmem:[%s1405_s7 + $0x18] sm:$0xff] }
  0x48   : > { %823 = vmatpush.msra.mxu3 %v775_v17 }
  0x4a   : > { %967 = vmatmul.msk.f32.gmra.mxu2 %vm628_vm2, %v476_v28  ;;  %824 = vmatpush.msra.mxu3 %v774_v20 }
  0x4c   : > { %825 = vmatpush.msra.mxu3 %v773_v24 }
  0x4d   : > { %960 = vmatmul.msk.f32.gmra.mxu1 %vm559_vm0, %v485_v34 }
  0x4e   : > { %826 = vmatpush.msra.mxu3 %v772_v26 }
  0x4f   : > { %952 = vmatmul.msk.f32.gmra.mxu0 %vm493_vm1, %v413_v37  ;;  %v770_v37 = vld [vmem:[%s1405_s7] sm:$0xff] }
  0x50   : > { %827 = vmatpush.msra.mxu3 %v771_v30 }
  0x52   : > { %968 = vmatmul.msk.f32.gmra.mxu2 %vm628_vm2, %v477_v41  ;;  %828 = vmatpush.msra.mxu3 %v770_v37 }
  0x55   : > { %961 = vmatmul.msk.f32.gmra.mxu1 %vm559_vm0, %v486_v45 }
  0x57   : > { %953 = vmatmul.msk.f32.gmra.mxu0 %vm493_vm1, %v414_v47 }
  0x5a   : > { %969 = vmatmul.msk.f32.gmra.mxu2 %vm628_vm2, %v478_v48 }
  0x9a   : > { %v601_v49 = vpop.f32.mrf.mxu1 }
  0x9c   : > { %v535_v50 = vpop.f32.mrf.mxu0 }
  0x9d   : > { %v602_v12 = vadd.f32 %v601_v49, %v535_v50 }
  0xa2   : > { %v604_v51 = vpop.f32.mrf.mxu1 }
  0xa4   : > { %v538_v52 = vpop.f32.mrf.mxu0 }
  0xa5   : > { %v670_v53 = vpop.f32.mrf.mxu2  ;;  %v605_v8 = vadd.f32 %v604_v51, %v538_v52 }
  0xa6   : > { %v694_v21 = vadd.f32 %v670_v53, %v602_v12 }
  0xa8   : > { %v706_v31 = vadd.f32 %v1341_v22, %v694_v21 }
  0xaa   : > { %v607_v54 = vpop.f32.mrf.mxu1  ;;  %v714_v41 = vmax.f32 %v706_v31, 0.0 }
  0xac   : > { %v541_v55 = vpop.f32.mrf.mxu0  ;;  %v722_v49 = vrot.slane %v714_v41, 4 }
  0xad   : > { %v673_v56 = vpop.f32.mrf.mxu2  ;;  %v608_v10 = vadd.f32 %v607_v54, %v541_v55 }
  0xae   : > { %v695_v18 = vadd.f32 %v673_v56, %v605_v8  ;;  %v723_v59 = vadd.f32 %v722_v49, %v714_v41  ;;  %v1016_v49 = vld [vmem:[%s1406_s8] ss:$0 sm:$0xff] }
  0xb0   : > { %v707_v27 = vadd.f32 %v1341_v22, %v695_v18 }
  0xb2   : > { %v610_v57 = vpop.f32.mrf.mxu1  ;;  %v715_v38 = vmax.f32 %v707_v27, 0.0 }
  0xb4   : > { %v544_v60 = vpop.f32.mrf.mxu0  ;;  %v728_v45 = vrot.slane %v715_v38, 4 }
  0xb5   : > { %v676_v61 = vpop.f32.mrf.mxu2  ;;  %v611_v13 = vadd.f32 %v610_v57, %v544_v60 }
  0xb6   : > { %v696_v19 = vadd.f32 %v676_v61, %v608_v10  ;;  %v729_v53 = vadd.f32 %v728_v45, %v715_v38 }
  0xb8   : > { %v708_v29 = vadd.f32 %v1341_v22, %v696_v19  ;;  %v730_v63 = vrot.slane %v729_v53, 2 }
  0xba   : > { %v613_v0 = vpop.f32.mrf.mxu1  ;;  %v716_v40 = vmax.f32 %v708_v29, 0.0 }
  0xbc   : > { %v547_v3 = vpop.f32.mrf.mxu0  ;;  %v734_v48 = vrot.slane %v716_v40, 4 }
  0xbd   : > { %v679_v4 = vpop.f32.mrf.mxu2  ;;  %v614_v15 = vadd.f32 %v613_v0, %v547_v3 }
  0xbe   : > { %v697_v23 = vadd.f32 %v679_v4, %v611_v13  ;;  %v735_v56 = vadd.f32 %v734_v48, %v716_v40  ;;  %v724_v4 = vrot.slane %v723_v59, 2 }
  0xc0   : > { %v709_v32 = vadd.f32 %v1341_v22, %v697_v23  ;;  %v736_v3 = vrot.slane %v735_v56, 2 }
  0xc2   : > { %v616_v9 = vpop.f32.mrf.mxu1  ;;  %v717_v42 = vmax.f32 %v709_v32, 0.0  ;;  %v737_v13 = vadd.f32 %v736_v3, %v735_v56 }
  0xc4   : > { %v550_v14 = vpop.f32.mrf.mxu0  ;;  %v740_v50 = vrot.slane %v717_v42, 4  ;;  %v738_v23 = vrot.slane %v737_v13, 1 }
  0xc5   : > { %v682_v16 = vpop.f32.mrf.mxu2  ;;  %v617_v28 = vadd.f32 %v616_v9, %v550_v14  ;;  %v731_v9 = vadd.f32 %v730_v63, %v729_v53  ;;  %v725_v14 = vadd.f32 %v724_v4, %v723_v59 }
  0xc6   : > { %v698_v25 = vadd.f32 %v682_v16, %v614_v15  ;;  %v741_v60 = vadd.f32 %v740_v50, %v717_v42  ;;  %v739_v32 = vadd.f32 %v738_v23, %v737_v13 }
  0xc7   : > { %v732_v19 = vrot.slane %v731_v9, 1 }
  0xc8   : > { %v710_v34 = vadd.f32 %v1341_v22, %v698_v25  ;;  %v742_v5 = vrot.slane %v741_v60, 2  ;;  %v726_v25 = vrot.slane %v725_v14, 1 }
  0xc9   : > { %v733_v29 = vadd.f32 %v732_v19, %v731_v9 }
  0xca   : > { %v619_v33 = vpop.f32.mrf.mxu1  ;;  %v718_v44 = vmax.f32 %v710_v34, 0.0  ;;  %v743_v15 = vadd.f32 %v742_v5, %v741_v60  ;;  %v727_v34 = vadd.f32 %v726_v25, %v725_v14 }
  0xcc   : > { %v553_v36 = vpop.f32.mrf.mxu0  ;;  %v746_v51 = vrot.slane %v718_v44, 4  ;;  %v744_v26 = vrot.slane %v743_v15, 1  ;;  %v799_v37 = vsel %vm798_vm3, %v733_v29, %v727_v34 }
  0xcd   : > { %v685_v35 = vpop.f32.mrf.mxu2  ;;  %v620_v47 = vadd.f32 %v619_v33, %v553_v36  ;;  %v801_v41 = vsel %vm800_vm4, %v739_v32, %v799_v37 }
  0xce   : > { %v699_v39 = vadd.f32 %v685_v35, %v617_v28  ;;  %v747_v62 = vadd.f32 %v746_v51, %v718_v44  ;;  %v745_v35 = vadd.f32 %v744_v26, %v743_v15 }
  0xd0   : > { %v711_v43 = vadd.f32 %v1341_v22, %v699_v39  ;;  %v748_v7 = vrot.slane %v747_v62, 2 }
  0xd2   : > { %v719_v46 = vmax.f32 %v711_v43, 0.0  ;;  %v622_v58 = vpop.f32.mrf.mxu1  ;;  %v749_v18 = vadd.f32 %v748_v7, %v747_v62  ;;  %v803_v43 = vsel %vm802_vm5, %v745_v35, %v801_v41 }
  0xd4   : > { %v752_v54 = vrot.slane %v719_v46, 4  ;;  %v556_v57 = vpop.f32.mrf.mxu0  ;;  %v750_v28 = vrot.slane %v749_v18, 1 }
  0xd5   : > { %v688_v52 = vpop.f32.mrf.mxu2  ;;  %v623_v2 = vadd.f32 %v622_v58, %v556_v57 }
  0xd6   : > { %v700_v55 = vadd.f32 %v688_v52, %v620_v47  ;;  %v753_v0 = vadd.f32 %v752_v54, %v719_v46 }
  0xd8   : > { %v712_v61 = vadd.f32 %v1341_v22, %v700_v55  ;;  %v754_v10 = vrot.slane %v753_v0, 2 }
  0xda   : > { %v720_v1 = vmax.f32 %v712_v61, 0.0  ;;  %v755_v20 = vadd.f32 %v754_v10, %v753_v0 }
  0xdc   : > { %v758_v6 = vrot.slane %v720_v1, 4  ;;  %v756_v30 = vrot.slane %v755_v20, 1 }
  0xdd   : > { %v691_v8 = vpop.f32.mrf.mxu2 }
  0xde   : > { %v759_v11 = vadd.f32 %v758_v6, %v720_v1  ;;  %v701_v12 = vadd.f32 %v691_v8, %v623_v2  ;;  %v757_v38 = vadd.f32 %v756_v30, %v755_v20 }
  0xe0   : > { %v760_v16 = vrot.slane %v759_v11, 2  ;;  %v713_v17 = vadd.f32 %v1341_v22, %v701_v12  ;;  %v751_v22 = vadd.f32 %v750_v28, %v749_v18 }
  0xe2   : > { %v721_v21 = vmax.f32 %v713_v17, 0.0  ;;  %v761_v24 = vadd.f32 %v760_v16, %v759_v11  ;;  %v805_v44 = vsel %vm804_vm6, %v751_v22, %v803_v43 }
  0xe3   : > { %v807_v46 = vsel %vm806_vm7, %v757_v38, %v805_v44 }
  0xe4   : > { %v764_v27 = vrot.slane %v721_v21, 4  ;;  %v762_v33 = vrot.slane %v761_v24, 1 }
  0xe6   : > { %v765_v31 = vadd.f32 %v764_v27, %v721_v21  ;;  %v763_v40 = vadd.f32 %v762_v33, %v761_v24 }
  0xe8   : > { %v766_v36 = vrot.slane %v765_v31, 2  ;;  %v809_v47 = vsel %vm808_vm8, %v763_v40, %v807_v46 }
  0xea   : > { %v767_v39 = vadd.f32 %v766_v36, %v765_v31 }
  0xec   : > { %v768_v42 = vrot.slane %v767_v39, 1 }
  0xee   : > { %v769_v45 = vadd.f32 %v768_v42, %v767_v39 }
  0xf0   : > { %v811_v48 = vsel %vm810_vm9, %v769_v45, %v809_v47 }
  0xf1   : > { %829 = vmatmul.f32.vlgmr.msra.gmra.mxu3 %v811_v48 }
 0x174   : > { %v830_v50 = vpop.f32.mrf.mxu3 }
 0x175   : > { %v831_v51 = vadd.f32 %v1016_v49, %v830_v50 }
 0x177   : > { %833 = vst [vmem:[%s362_s13] sm:$0xff] %v831_v51 }
 0x178   : > { %1044 = shalt.err (!%p1041_p3)
}
 0x179   : > { %976 = dma.vmem_to_hbm [thread:$0]  (%p1166_p5), %s848_s22, 128, %s850_s23, %s835_s24  }
 0x17a PF: > { %p982_p4 = scmp.ge.s32.totalorder %s1079_s12, 2  ;;  %s861_s28 = sand.u32 1, %s1067_s30  }
 0x17b   : > { %s862_s16 = scalar_lea.sflag [#allocation3], %s861_s28 }
 0x17c   : > { %p979_p7 = pnand %p982_p4, %p1170_p6 }
 0x17e   : > { %p980_p8 = pneg %p979_p7 }
 0x180   : > { %1062 = dma.done.wait (%p980_p8), %s862_s16, 128  }
 0x181   : > { %1064 = vsyncadd (%p980_p8), %s862_s16, 4294967168  ;;  %p19_p9 = scmp.ge.s32.totalorder %s1154_s15, 4   ;;  %s1412_s30 = smov %s1071_s10 }
 0x182   : > { %s1413_s10 = smov %s1075_s11  ;;  %s1414_s11 = smov %s1164_s18 }
 0x183   : > { %s1415_s12 = smov %s1154_s15  ;;  %21 = sbr.rel (!%p19_p9) target bundleno = 5 (0x5), region = 97 }
 0x188   :  { %868 = vsyncpa [#allocation3], 1 }
 0x189   :  { %870 = vsyncpa [#allocation3 + $0x1], 1 }

</bundles_post_ra>
